<compile_context>
chip_gen: v6e
topology: v6e:2x2x1
jax: 0.10.0
libtpu: 0.0.40
codegen_flags: <defaults>
</compile_context>

<pallas_src>
import functools
import numpy as np
import jax
import jax.numpy as jnp
from jax.experimental import pallas as pl
from jax.experimental.pallas import tpu as pltpu


def _layernorm_kernel(x_ref, w_ref, b_ref, o_ref, *, eps):
    """x_ref: (TM, C)  w_ref/b_ref: (1, C)  o_ref: (TM, C)."""
    x = x_ref[...].astype(jnp.float32)                    # (TM, C)
    mu = jnp.mean(x, axis=-1, keepdims=True)              # (TM, 1)
    xc = x - mu
    var = jnp.mean(xc * xc, axis=-1, keepdims=True)       # biased variance
    inv = jax.lax.rsqrt(var + eps)                        # EUP rsqrt (free slot)
    w = w_ref[...].astype(jnp.float32)                    # (1, C) -> broadcast rows
    b = b_ref[...].astype(jnp.float32)
    o_ref[...] = ((xc * inv) * w + b).astype(o_ref.dtype)


def withbias_layernorm(x, weight, bias, *, eps=1e-5, vmem_block_bytes=3 * 1024 * 1024):
    """x: (..., C), weight/bias: (C,). Returns LayerNorm(x) with same shape/dtype."""
    orig_shape = x.shape
    C = int(orig_shape[-1])
    assert weight.shape == (C,) and bias.shape == (C,)

    m = 1
    for d in orig_shape[:-1]:
        m *= int(d)
    x2 = x.reshape(m, C)

    # ---- Row-tile sizing from a VMEM byte budget (perf-review item 1) ----------
    # A (tm, C) block costs tm * round_up(C, 128) * 4 bytes of VMEM once lane
    # padding and the in-kernel f32 upcast are accounted for.  Budgeting ~3 MiB
    # per block keeps (double-buffered in + out + temporaries) comfortably inside
    # a 32 MiB scoped VMEM limit on v5e/v6e/v7x while moving ~MiBs of HBM per
    # grid step (>=80% of HBM roofline vs ~30% at the old 256-row tiles).
    lanes = ((C + 127) // 128) * 128
    rows = vmem_block_bytes // (lanes * 4)
    rows = max(16, (rows // 16) * 16)              # sublane multiple; bf16-safe (16)
    tm = min(rows, ((m + 15) // 16) * 16)          # never (usefully) exceed m
    grid = (pl.cdiv(m, tm),)                       # ragged last block handled by Pallas

    w2 = weight.reshape(1, C)
    b2 = bias.reshape(1, C)

    out = pl.pallas_call(
        functools.partial(_layernorm_kernel, eps=float(eps)),
        out_shape=jax.ShapeDtypeStruct((m, C), x.dtype),
        grid_spec=pltpu.PrefetchScalarGridSpec(
            num_scalar_prefetch=0,
            grid=grid,
            in_specs=[
                pl.BlockSpec((tm, C), lambda i: (i, 0)),   # row tile of x
                pl.BlockSpec((1, C), lambda i: (0, 0)),    # weight (resident)
                pl.BlockSpec((1, C), lambda i: (0, 0)),    # bias   (resident)
            ],
            out_specs=pl.BlockSpec((tm, C), lambda i: (i, 0)),
        ),
        compiler_params=pltpu.CompilerParams(
            # Rows are independent -> shard the single grid axis across v7x's
            # two TensorCores (no-op on v5e / v6e).
            dimension_semantics=("parallel",),
            vmem_limit_bytes=32 * 1024 * 1024,
        ),
    )(x2, w2, b2)

    return out.reshape(orig_shape)


# --- pure-JAX reference (matches the PyTorch forward) --------------------------
def _ref_layernorm(x, weight, bias, eps=1e-5):
    x32 = x.astype(jnp.float32)
    mu = jnp.mean(x32, axis=-1, keepdims=True)
    var = jnp.mean((x32 - mu) ** 2, axis=-1, keepdims=True)  # unbiased=False
    y = (x32 - mu) / jnp.sqrt(var + eps) * weight.astype(jnp.float32) \
        + bias.astype(jnp.float32)
    return y.astype(x.dtype)


def _check(out, ref, atol, rtol, name):
    out = np.asarray(out, dtype=np.float32)
    ref = np.asarray(ref, dtype=np.float32)
    max_err = float(np.max(np.abs(out - ref)))
    assert np.allclose(out, ref, atol=atol, rtol=rtol), (name, max_err)


if __name__ == "__main__":
    key = jax.random.PRNGKey(0)
    k_x, k_w, k_b, k_x2, k_w2, k_b2 = jax.random.split(key, 6)

    # ---- 1) Main check: UHDDIP-style to_3d input (B, H*W, C), f32 -------------
    B, HW, C = 2, 16 * 16, 32
    x = jax.random.normal(k_x, (B, HW, C), dtype=jnp.float32)
    weight = 1.0 + 0.1 * jax.random.normal(k_w, (C,), dtype=jnp.float32)
    bias = 0.1 * jax.random.normal(k_b, (C,), dtype=jnp.float32)

    out = jax.block_until_ready(withbias_layernorm(x, weight, bias))
    ref = jax.block_until_ready(_ref_layernorm(x, weight, bias))
    assert out.shape == x.shape and out.dtype == x.dtype
    _check(out, ref, 1e-4, 1e-4, "f32 main")

    # ---- 2) Ragged rows, no wrapper padding: M = 273 not a tile multiple ------
    C2 = 48
    x_r = jax.random.normal(k_x2, (3, 7 * 13, C2), dtype=jnp.float32)
    w_r = 1.0 + 0.1 * jax.random.normal(k_w2, (C2,), dtype=jnp.float32)
    b_r = 0.1 * jax.random.normal(k_b2, (C2,), dtype=jnp.float32)

    out_r = jax.block_until_ready(withbias_layernorm(x_r, w_r, b_r))
    _check(out_r, _ref_layernorm(x_r, w_r, b_r), 1e-4, 1e-4, "f32 ragged single-block")

    # Force several grid steps with a ragged last block (small VMEM budget).
    out_rs = jax.block_until_ready(
        withbias_layernorm(x_r, w_r, b_r, vmem_block_bytes=32 * 1024))
    _check(out_rs, _ref_layernorm(x_r, w_r, b_r), 1e-4, 1e-4, "f32 ragged multi-step")

    # ---- 3) bf16 activations (halved HBM traffic), f32 math in-kernel ---------
    x_bf = x.astype(jnp.bfloat16)
    out_bf = jax.block_until_ready(withbias_layernorm(x_bf, weight, bias))
    assert out_bf.dtype == jnp.bfloat16
    _check(out_bf, _ref_layernorm(x_bf, weight, bias), 5e-2, 5e-2, "bf16")

    print("KERNEL_OK")
</pallas_src>

<mosaic_0001>
module attributes {stable_mosaic.version = 11 : i64} {
  func.func @_layernorm_kernel(%arg0: i32, %arg1: memref<512x32xf32, #tpu.memory_space<vmem>>, %arg2: memref<1x32xf32, #tpu.memory_space<vmem>>, %arg3: memref<1x32xf32, #tpu.memory_space<vmem>>, %arg4: memref<512x32xf32, #tpu.memory_space<vmem>>) attributes {dimension_semantics = [#tpu.dimension_semantics<parallel>], iteration_bounds = array<i64: 1>, scalar_prefetch = 0 : i64, scratch_operands = 0 : i64, tpu.core_type = #tpu.core_type<tc>, window_params = [{transform_indices = @transform_0, window_bounds = array<i64: 512, 32>}, {pipeline_mode = #tpu.pipeline_mode<synchronous>, transform_indices = @transform_1, window_bounds = array<i64: 1, 32>}, {pipeline_mode = #tpu.pipeline_mode<synchronous>, transform_indices = @transform_2, window_bounds = array<i64: 1, 32>}, {transform_indices = @transform_3, window_bounds = array<i64: 512, 32>}]} {
    %c0 = arith.constant 0 : index
    %c0_0 = arith.constant 0 : index
    %0 = vector.load %arg1[%c0, %c0_0] : memref<512x32xf32, #tpu.memory_space<vmem>>, vector<512x32xf32>
    %cst = arith.constant dense<0.000000e+00> : vector<512xf32>
    %1 = vector.multi_reduction <add>, %0, %cst [1] : vector<512x32xf32> to vector<512xf32>
    %2 = vector.shape_cast %1 : vector<512xf32> to vector<512x1xf32>
    %cst_1 = arith.constant 3.200000e+01 : f32
    %3 = vector.broadcast %cst_1 : f32 to vector<512x1xf32>
    %4 = arith.divf %2, %3 : vector<512x1xf32>
    %5 = vector.broadcast %4 : vector<512x1xf32> to vector<512x32xf32>
    %6 = arith.subf %0, %5 : vector<512x32xf32>
    %7 = arith.mulf %6, %6 : vector<512x32xf32>
    %cst_2 = arith.constant dense<0.000000e+00> : vector<512xf32>
    %8 = vector.multi_reduction <add>, %7, %cst_2 [1] : vector<512x32xf32> to vector<512xf32>
    %9 = vector.shape_cast %8 : vector<512xf32> to vector<512x1xf32>
    %cst_3 = arith.constant 3.200000e+01 : f32
    %10 = vector.broadcast %cst_3 : f32 to vector<512x1xf32>
    %11 = arith.divf %9, %10 : vector<512x1xf32>
    %cst_4 = arith.constant 9.99999974E-6 : f32
    %12 = vector.broadcast %cst_4 : f32 to vector<512x1xf32>
    %13 = arith.addf %11, %12 : vector<512x1xf32>
    %14 = math.rsqrt %13 : vector<512x1xf32>
    %c0_5 = arith.constant 0 : index
    %c0_6 = arith.constant 0 : index
    %15 = vector.load %arg2[%c0_5, %c0_6] : memref<1x32xf32, #tpu.memory_space<vmem>>, vector<1x32xf32>
    %c0_7 = arith.constant 0 : index
    %c0_8 = arith.constant 0 : index
    %16 = vector.load %arg3[%c0_7, %c0_8] : memref<1x32xf32, #tpu.memory_space<vmem>>, vector<1x32xf32>
    %17 = vector.broadcast %14 : vector<512x1xf32> to vector<512x32xf32>
    %18 = arith.mulf %6, %17 : vector<512x32xf32>
    %19 = vector.broadcast %15 : vector<1x32xf32> to vector<512x32xf32>
    %20 = arith.mulf %18, %19 : vector<512x32xf32>
    %21 = vector.broadcast %16 : vector<1x32xf32> to vector<512x32xf32>
    %22 = arith.addf %20, %21 : vector<512x32xf32>
    %c0_9 = arith.constant 0 : index
    %c0_10 = arith.constant 0 : index
    %23 = vector.load %arg4[%c0_9, %c0_10] : memref<512x32xf32, #tpu.memory_space<vmem>>, vector<512x32xf32>
    tpu.vector_store %arg4[%c0_9, %c0_10], %22 {strides = array<i32>} : memref<512x32xf32, #tpu.memory_space<vmem>>, vector<512x32xf32>,
    return
  }
  func.func @transform_0(%arg0: i32) -> (i32, i32) {
    %c0_i32 = arith.constant 0 : i32
    %c0_i32_0 = arith.constant 0 : i32
    return %arg0, %c0_i32 : i32, i32
  }
  func.func @transform_1(%arg0: i32) -> (i32, i32) {
    %c0_i32 = arith.constant 0 : i32
    %c0_i32_0 = arith.constant 0 : i32
    %c0_i32_1 = arith.constant 0 : i32
    return %c0_i32, %c0_i32_0 : i32, i32
  }
  func.func @transform_2(%arg0: i32) -> (i32, i32) {
    %c0_i32 = arith.constant 0 : i32
    %c0_i32_0 = arith.constant 0 : i32
    %c0_i32_1 = arith.constant 0 : i32
    return %c0_i32, %c0_i32_0 : i32, i32
  }
  func.func @transform_3(%arg0: i32) -> (i32, i32) {
    %c0_i32 = arith.constant 0 : i32
    %c0_i32_0 = arith.constant 0 : i32
    return %arg0, %c0_i32 : i32, i32
  }
}

</mosaic_0001>

<bundles_post_ra>
// kernel: tpu_custom_call.1
= control target key start
LH: loop header
LB: loop body
LE: loop exit
PB: predicated region body
PF: predicated region fallthrough
CT: control target
= control target key end

     0   :  { %vm78_vm0 = vcmask 261120   ;;  %s2556_s0 = inlined_call_operand.vmem [shape: f32[512,32], index: 0, kind: input, shape index: {}]   ;;  %s2557_s1 = inlined_call_operand.vmem [shape: f32[1,32], index: 1, kind: input, shape index: {}]   ;;  %s2558_s2 = inlined_call_operand.vmem [shape: f32[1,32], index: 2, kind: input, shape index: {}]   ;;  %s2559_s3 = inlined_call_operand.vmem [shape: f32[512,32], index: 3, kind: output, shape index: {}]  }
   0x1   :  { %v1277_v0 = vld [vmem:[%s2556_s0] sm:$0xff]  ;;  %v1282_v1 = vld [vmem:[%s2556_s0 + $0x10] sm:$0xff]  ;;  %v1287_v2 = vld [vmem:[%s2556_s0 + $0x8] sm:$0xff] }
   0x2   :  { %v79_v3 = vsel %vm78_vm0, %v1277_v0, 0.0  ;;  %v85_v4 = vsel %vm78_vm0, %v1282_v1, 0.0  ;;  %v1296_v5 = vld [vmem:[%s2556_s0 + $0x18] sm:$0xff]  ;;  %v82_v6 = vsel %vm78_vm0, %v1287_v2, 0.0  ;;  %v1305_v8 = vld [vmem:[%s2556_s0 + $0x20] sm:$0xff]  ;;  %v1310_v9 = vld [vmem:[%s2556_s0 + $0x28] sm:$0xff] }
   0x3   :  { %80 = vadd.xlane.f32.xlu0 %v79_v3  ;;  %86 = vadd.xlane.f32.xlu1 %v85_v4  ;;  %v88_v7 = vsel %vm78_vm0, %v1296_v5, 0.0  ;;  %v91_v10 = vsel %vm78_vm0, %v1305_v8, 0.0  ;;  %v94_v11 = vsel %vm78_vm0, %v1310_v9, 0.0  ;;  %v1319_v12 = vld [vmem:[%s2556_s0 + $0x30] sm:$0xff]  ;;  %v1324_v13 = vld [vmem:[%s2556_s0 + $0x38] sm:$0xff]  ;;  %v1333_v16 = vld [vmem:[%s2556_s0 + $0x40] sm:$0xff] }
   0x4   :  { %v97_v14 = vsel %vm78_vm0, %v1319_v12, 0.0  ;;  %v100_v15 = vsel %vm78_vm0, %v1324_v13, 0.0  ;;  %v1338_v17 = vld [vmem:[%s2556_s0 + $0x48] sm:$0xff]  ;;  %v103_v18 = vsel %vm78_vm0, %v1333_v16, 0.0  ;;  %v1347_v20 = vld [vmem:[%s2556_s0 + $0x50] sm:$0xff]  ;;  %v1352_v21 = vld [vmem:[%s2556_s0 + $0x58] sm:$0xff] }
   0x5   :  { %v106_v19 = vsel %vm78_vm0, %v1338_v17, 0.0  ;;  %v109_v22 = vsel %vm78_vm0, %v1347_v20, 0.0  ;;  %v112_v23 = vsel %vm78_vm0, %v1352_v21, 0.0  ;;  %v1361_v24 = vld [vmem:[%s2556_s0 + $0x60] sm:$0xff]  ;;  %v1366_v25 = vld [vmem:[%s2556_s0 + $0x68] sm:$0xff]  ;;  %v1375_v28 = vld [vmem:[%s2556_s0 + $0x70] sm:$0xff] }
   0x6   :  { %v115_v26 = vsel %vm78_vm0, %v1361_v24, 0.0  ;;  %v118_v27 = vsel %vm78_vm0, %v1366_v25, 0.0  ;;  %v1380_v29 = vld [vmem:[%s2556_s0 + $0x78] sm:$0xff]  ;;  %v121_v30 = vsel %vm78_vm0, %v1375_v28, 0.0  ;;  %v1389_v32 = vld [vmem:[%s2556_s0 + $0x80] sm:$0xff]  ;;  %v1394_v33 = vld [vmem:[%s2556_s0 + $0x88] sm:$0xff] }
   0x7   :  { %83 = vadd.xlane.f32.xlu0 %v82_v6  ;;  %89 = vadd.xlane.f32.xlu1 %v88_v7  ;;  %v124_v31 = vsel %vm78_vm0, %v1380_v29, 0.0  ;;  %v127_v34 = vsel %vm78_vm0, %v1389_v32, 0.0  ;;  %v130_v35 = vsel %vm78_vm0, %v1394_v33, 0.0  ;;  %v1403_v36 = vld [vmem:[%s2556_s0 + $0x90] sm:$0xff]  ;;  %v1408_v37 = vld [vmem:[%s2556_s0 + $0x98] sm:$0xff]  ;;  %v1417_v40 = vld [vmem:[%s2556_s0 + $0xa0] sm:$0xff] }
   0x8   :  { %v133_v38 = vsel %vm78_vm0, %v1403_v36, 0.0  ;;  %v136_v39 = vsel %vm78_vm0, %v1408_v37, 0.0  ;;  %v1422_v41 = vld [vmem:[%s2556_s0 + $0xa8] sm:$0xff]  ;;  %v139_v42 = vsel %vm78_vm0, %v1417_v40, 0.0  ;;  %v1431_v44 = vld [vmem:[%s2556_s0 + $0xb0] sm:$0xff]  ;;  %v1436_v45 = vld [vmem:[%s2556_s0 + $0xb8] sm:$0xff] }
   0x9   :  { %v142_v43 = vsel %vm78_vm0, %v1422_v41, 0.0  ;;  %v145_v46 = vsel %vm78_vm0, %v1431_v44, 0.0  ;;  %v148_v47 = vsel %vm78_vm0, %v1436_v45, 0.0  ;;  %v1445_v48 = vld [vmem:[%s2556_s0 + $0xc0] sm:$0xff]  ;;  %v1450_v49 = vld [vmem:[%s2556_s0 + $0xc8] sm:$0xff]  ;;  %v1459_v52 = vld [vmem:[%s2556_s0 + $0xd0] sm:$0xff] }
   0xa   :  { %v151_v50 = vsel %vm78_vm0, %v1445_v48, 0.0  ;;  %v154_v51 = vsel %vm78_vm0, %v1450_v49, 0.0  ;;  %v1464_v53 = vld [vmem:[%s2556_s0 + $0xd8] sm:$0xff]  ;;  %v157_v54 = vsel %vm78_vm0, %v1459_v52, 0.0  ;;  %v1473_v56 = vld [vmem:[%s2556_s0 + $0xe0] sm:$0xff]  ;;  %v1478_v57 = vld [vmem:[%s2556_s0 + $0xe8] sm:$0xff] }
   0xb   :  { %92 = vadd.xlane.f32.xlu0 %v91_v10  ;;  %95 = vadd.xlane.f32.xlu1 %v94_v11  ;;  %v160_v55 = vsel %vm78_vm0, %v1464_v53, 0.0  ;;  %v163_v58 = vsel %vm78_vm0, %v1473_v56, 0.0  ;;  %v166_v59 = vsel %vm78_vm0, %v1478_v57, 0.0  ;;  %v1487_v60 = vld [vmem:[%s2556_s0 + $0xf0] sm:$0xff]  ;;  %v1492_v61 = vld [vmem:[%s2556_s0 + $0xf8] sm:$0xff]  ;;  %v1501_v3 = vld [vmem:[%s2556_s0 + $0x100] sm:$0xff] }
   0xc   :  { %v169_v62 = vsel %vm78_vm0, %v1487_v60, 0.0  ;;  %v172_v63 = vsel %vm78_vm0, %v1492_v61, 0.0  ;;  %v1506_v4 = vld [vmem:[%s2556_s0 + $0x108] sm:$0xff]  ;;  %v175_v6 = vsel %vm78_vm0, %v1501_v3, 0.0  ;;  %v1515_v10 = vld [vmem:[%s2556_s0 + $0x110] sm:$0xff]  ;;  %v1520_v11 = vld [vmem:[%s2556_s0 + $0x118] sm:$0xff] }
   0xd   :  { %v178_v7 = vsel %vm78_vm0, %v1506_v4, 0.0 }
   0xf   :  { %98 = vadd.xlane.f32.xlu0 %v97_v14  ;;  %101 = vadd.xlane.f32.xlu1 %v100_v15  ;;  %v181_v14 = vsel %vm78_vm0, %v1515_v10, 0.0  ;;  %v184_v15 = vsel %vm78_vm0, %v1520_v11, 0.0 }
  0x13   :  { %104 = vadd.xlane.f32.xlu0 %v103_v18  ;;  %107 = vadd.xlane.f32.xlu1 %v106_v19  ;;  %v1529_v18 = vld [vmem:[%s2556_s0 + $0x120] sm:$0xff]  ;;  %v1534_v19 = vld [vmem:[%s2556_s0 + $0x128] sm:$0xff] }
  0x17   :  { %110 = vadd.xlane.f32.xlu0 %v109_v22  ;;  %113 = vadd.xlane.f32.xlu1 %v112_v23  ;;  %v187_v22 = vsel %vm78_vm0, %v1529_v18, 0.0  ;;  %v190_v23 = vsel %vm78_vm0, %v1534_v19, 0.0 }
  0x1b   :  { %116 = vadd.xlane.f32.xlu0 %v115_v26  ;;  %119 = vadd.xlane.f32.xlu1 %v118_v27  ;;  %v1543_v26 = vld [vmem:[%s2556_s0 + $0x130] sm:$0xff]  ;;  %v1548_v27 = vld [vmem:[%s2556_s0 + $0x138] sm:$0xff] }
  0x1f   :  { %122 = vadd.xlane.f32.xlu0 %v121_v30  ;;  %125 = vadd.xlane.f32.xlu1 %v124_v31  ;;  %v193_v30 = vsel %vm78_vm0, %v1543_v26, 0.0  ;;  %v196_v31 = vsel %vm78_vm0, %v1548_v27, 0.0 }
  0x23   :  { %128 = vadd.xlane.f32.xlu0 %v127_v34  ;;  %131 = vadd.xlane.f32.xlu1 %v130_v35  ;;  %v1557_v34 = vld [vmem:[%s2556_s0 + $0x140] sm:$0xff]  ;;  %v1562_v35 = vld [vmem:[%s2556_s0 + $0x148] sm:$0xff] }
  0x27   :  { %134 = vadd.xlane.f32.xlu0 %v133_v38  ;;  %137 = vadd.xlane.f32.xlu1 %v136_v39  ;;  %v199_v38 = vsel %vm78_vm0, %v1557_v34, 0.0  ;;  %v202_v39 = vsel %vm78_vm0, %v1562_v35, 0.0 }
  0x2b   :  { %140 = vadd.xlane.f32.xlu0 %v139_v42  ;;  %143 = vadd.xlane.f32.xlu1 %v142_v43  ;;  %v1571_v42 = vld [vmem:[%s2556_s0 + $0x150] sm:$0xff]  ;;  %v1576_v43 = vld [vmem:[%s2556_s0 + $0x158] sm:$0xff] }
  0x2f   :  { %146 = vadd.xlane.f32.xlu0 %v145_v46  ;;  %149 = vadd.xlane.f32.xlu1 %v148_v47  ;;  %v205_v46 = vsel %vm78_vm0, %v1571_v42, 0.0  ;;  %v208_v47 = vsel %vm78_vm0, %v1576_v43, 0.0 }
  0x33   :  { %152 = vadd.xlane.f32.xlu0 %v151_v50  ;;  %155 = vadd.xlane.f32.xlu1 %v154_v51  ;;  %v1585_v50 = vld [vmem:[%s2556_s0 + $0x160] sm:$0xff]  ;;  %v1590_v51 = vld [vmem:[%s2556_s0 + $0x168] sm:$0xff] }
  0x37   :  { %158 = vadd.xlane.f32.xlu0 %v157_v54  ;;  %161 = vadd.xlane.f32.xlu1 %v160_v55  ;;  %v211_v54 = vsel %vm78_vm0, %v1585_v50, 0.0  ;;  %v214_v55 = vsel %vm78_vm0, %v1590_v51, 0.0 }
  0x3b   :  { %164 = vadd.xlane.f32.xlu0 %v163_v58  ;;  %167 = vadd.xlane.f32.xlu1 %v166_v59  ;;  %v1599_v58 = vld [vmem:[%s2556_s0 + $0x170] sm:$0xff]  ;;  %v1604_v59 = vld [vmem:[%s2556_s0 + $0x178] sm:$0xff] }
  0x3f   :  { %170 = vadd.xlane.f32.xlu0 %v169_v62  ;;  %173 = vadd.xlane.f32.xlu1 %v172_v63  ;;  %v217_v62 = vsel %vm78_vm0, %v1599_v58, 0.0  ;;  %v220_v63 = vsel %vm78_vm0, %v1604_v59, 0.0 }
  0x43   :  { %176 = vadd.xlane.f32.xlu0 %v175_v6  ;;  %179 = vadd.xlane.f32.xlu1 %v178_v7  ;;  %v1613_v6 = vld [vmem:[%s2556_s0 + $0x180] sm:$0xff]  ;;  %v1618_v7 = vld [vmem:[%s2556_s0 + $0x188] sm:$0xff] }
  0x47   :  { %182 = vadd.xlane.f32.xlu0 %v181_v14  ;;  %185 = vadd.xlane.f32.xlu1 %v184_v15  ;;  %v223_v14 = vsel %vm78_vm0, %v1613_v6, 0.0  ;;  %v226_v15 = vsel %vm78_vm0, %v1618_v7, 0.0 }
  0x4b   :  { %188 = vadd.xlane.f32.xlu0 %v187_v22  ;;  %191 = vadd.xlane.f32.xlu1 %v190_v23  ;;  %v1627_v22 = vld [vmem:[%s2556_s0 + $0x190] sm:$0xff]  ;;  %v1632_v23 = vld [vmem:[%s2556_s0 + $0x198] sm:$0xff] }
  0x4c   :  { %2592 = vst [vmem:[#allocation2_spill] sm:$0xff] %v1627_v22  ;;  %2593 = vst [vmem:[#allocation3_spill] sm:$0xff] %v1632_v23 }
  0x4f   :  { %194 = vadd.xlane.f32.xlu0 %v193_v30  ;;  %197 = vadd.xlane.f32.xlu1 %v196_v31  ;;  %v229_v30 = vsel %vm78_vm0, %v1627_v22, 0.0  ;;  %v232_v31 = vsel %vm78_vm0, %v1632_v23, 0.0 }
  0x53   :  { %200 = vadd.xlane.f32.xlu0 %v199_v38  ;;  %203 = vadd.xlane.f32.xlu1 %v202_v39  ;;  %v1641_v38 = vld [vmem:[%s2556_s0 + $0x1a0] sm:$0xff]  ;;  %v1646_v39 = vld [vmem:[%s2556_s0 + $0x1a8] sm:$0xff] }
  0x54   :  { %2594 = vst [vmem:[#allocation4_spill] sm:$0xff] %v1641_v38  ;;  %2595 = vst [vmem:[#allocation5_spill] sm:$0xff] %v1646_v39 }
  0x57   :  { %206 = vadd.xlane.f32.xlu0 %v205_v46  ;;  %209 = vadd.xlane.f32.xlu1 %v208_v47  ;;  %v235_v46 = vsel %vm78_vm0, %v1641_v38, 0.0  ;;  %v238_v47 = vsel %vm78_vm0, %v1646_v39, 0.0 }
  0x5b   :  { %212 = vadd.xlane.f32.xlu0 %v211_v54  ;;  %215 = vadd.xlane.f32.xlu1 %v214_v55  ;;  %v1655_v54 = vld [vmem:[%s2556_s0 + $0x1b0] sm:$0xff]  ;;  %v1660_v55 = vld [vmem:[%s2556_s0 + $0x1b8] sm:$0xff] }
  0x5c   :  { %2596 = vst [vmem:[#allocation6_spill] sm:$0xff] %v1655_v54  ;;  %2597 = vst [vmem:[#allocation7_spill] sm:$0xff] %v1660_v55 }
  0x5f   :  { %218 = vadd.xlane.f32.xlu0 %v217_v62  ;;  %221 = vadd.xlane.f32.xlu1 %v220_v63  ;;  %v241_v62 = vsel %vm78_vm0, %v1655_v54, 0.0  ;;  %v244_v63 = vsel %vm78_vm0, %v1660_v55, 0.0 }
  0x63   :  { %224 = vadd.xlane.f32.xlu0 %v223_v14  ;;  %227 = vadd.xlane.f32.xlu1 %v226_v15  ;;  %v1669_v14 = vld [vmem:[%s2556_s0 + $0x1c0] sm:$0xff]  ;;  %v1674_v15 = vld [vmem:[%s2556_s0 + $0x1c8] sm:$0xff] }
  0x64   :  { %2598 = vst [vmem:[#allocation8_spill] sm:$0xff] %v1669_v14  ;;  %2599 = vst [vmem:[#allocation9_spill] sm:$0xff] %v1674_v15 }
  0x67   :  { %230 = vadd.xlane.f32.xlu0 %v229_v30  ;;  %233 = vadd.xlane.f32.xlu1 %v232_v31  ;;  %v247_v30 = vsel %vm78_vm0, %v1669_v14, 0.0  ;;  %v250_v31 = vsel %vm78_vm0, %v1674_v15, 0.0  ;;  %v1697_v15 = vld [vmem:[%s2556_s0 + $0x1e0] sm:$0xff]  ;;  %v1702_v14 = vld [vmem:[%s2556_s0 + $0x1e8] sm:$0xff] }
  0x68   :  { %2602 = vst [vmem:[#allocation12_spill] sm:$0xff] %v1697_v15  ;;  %2603 = vst [vmem:[#allocation13_spill] sm:$0xff] %v1702_v14 }
  0x6b   :  { %236 = vadd.xlane.f32.xlu0 %v235_v46  ;;  %239 = vadd.xlane.f32.xlu1 %v238_v47  ;;  %v1683_v46 = vld [vmem:[%s2556_s0 + $0x1d0] sm:$0xff]  ;;  %v1688_v47 = vld [vmem:[%s2556_s0 + $0x1d8] sm:$0xff] }
  0x6c   :  { %2600 = vst [vmem:[#allocation10_spill] sm:$0xff] %v1683_v46  ;;  %2601 = vst [vmem:[#allocation11_spill] sm:$0xff] %v1688_v47 }
  0x6f   :  { %242 = vadd.xlane.f32.xlu0 %v241_v62  ;;  %245 = vadd.xlane.f32.xlu1 %v244_v63  ;;  %v253_v62 = vsel %vm78_vm0, %v1683_v46, 0.0  ;;  %v256_v63 = vsel %vm78_vm0, %v1688_v47, 0.0  ;;  %v1711_v47 = vld [vmem:[%s2556_s0 + $0x1f0] sm:$0xff]  ;;  %v1716_v46 = vld [vmem:[%s2556_s0 + $0x1f8] sm:$0xff] }
  0x70   :  { %2604 = vst [vmem:[#allocation14_spill] sm:$0xff] %v1711_v47 }
  0x73   :  { %248 = vadd.xlane.f32.xlu0 %v247_v30  ;;  %251 = vadd.xlane.f32.xlu1 %v250_v31  ;;  %v259_v30 = vsel %vm78_vm0, %v1697_v15, 0.0  ;;  %v262_v31 = vsel %vm78_vm0, %v1702_v14, 0.0 }
  0x77   :  { %254 = vadd.xlane.f32.xlu0 %v253_v62  ;;  %257 = vadd.xlane.f32.xlu1 %v256_v63  ;;  %v265_v62 = vsel %vm78_vm0, %v1711_v47, 0.0  ;;  %v268_v63 = vsel %vm78_vm0, %v1716_v46, 0.0 }
  0x7b   :  { %260 = vadd.xlane.f32.xlu0 %v259_v30  ;;  %263 = vadd.xlane.f32.xlu1 %v262_v31 }
  0x7f   :  { %266 = vadd.xlane.f32.xlu0 %v265_v62  ;;  %269 = vadd.xlane.f32.xlu1 %v268_v63 }
  0x8c   :  { %v81_v14 = vpop.xlane.xlu0 %80  ;;  %v87_v15 = vpop.xlane.xlu1 %86 }
  0x8d   :  { %v272_v55 = vmul.f32 0.03125, %v81_v14  ;;  %v274_v54 = vmul.f32 0.03125, %v87_v15 }
  0x8f   :  { %v1723_v39 = vsub.f32 %v1277_v0, %v272_v55  ;;  %v1726_v38 = vsub.f32 %v1282_v1, %v274_v54 }
  0x90   :  { %v84_v30 = vpop.xlane.xlu0 %83  ;;  %v90_v31 = vpop.xlane.xlu1 %89 }
  0x91   :  { %2605 = vst [vmem:[#allocation15_spill] sm:$0xff] %v1726_v38  ;;  %v273_v23 = vmul.f32 0.03125, %v84_v30  ;;  %v275_v22 = vmul.f32 0.03125, %v90_v31  ;;  %v400_v47 = vmul.f32 %v1723_v39, %v1723_v39  ;;  %v402_v62 = vmul.f32 %v1726_v38, %v1726_v38 }
  0x93   :  { %v1733_v63 = vsub.f32 %v1287_v2, %v273_v23  ;;  %v1736_v14 = vsub.f32 %v1296_v5, %v275_v22  ;;  %v464_v0 = vsel %vm78_vm0, %v400_v47, 0.0  ;;  %v470_v55 = vsel %vm78_vm0, %v402_v62, 0.0 }
  0x94   :  { %465 = vadd.xlane.f32.xlu0 %v464_v0  ;;  %v93_v1 = vpop.xlane.xlu0 %92  ;;  %v96_v54 = vpop.xlane.xlu1 %95 }
  0x95   :  { %v276_v15 = vmul.f32 0.03125, %v93_v1  ;;  %v277_v30 = vmul.f32 0.03125, %v96_v54  ;;  %v401_v31 = vmul.f32 %v1733_v63, %v1733_v63  ;;  %v403_v38 = vmul.f32 %v1736_v14, %v1736_v14 }
  0x97   :  { %v1745_v2 = vsub.f32 %v1305_v8, %v276_v15  ;;  %v1748_v5 = vsub.f32 %v1310_v9, %v277_v30  ;;  %v467_v22 = vsel %vm78_vm0, %v401_v31, 0.0  ;;  %v473_v62 = vsel %vm78_vm0, %v403_v38, 0.0 }
  0x98   :  { %471 = vadd.xlane.f32.xlu0 %v470_v55  ;;  %468 = vadd.xlane.f32.xlu1 %v467_v22  ;;  %v99_v23 = vpop.xlane.xlu0 %98  ;;  %v102_v47 = vpop.xlane.xlu1 %101 }
  0x99   :  { %v278_v0 = vmul.f32 0.03125, %v99_v23  ;;  %v279_v1 = vmul.f32 0.03125, %v102_v47  ;;  %v404_v54 = vmul.f32 %v1745_v2, %v1745_v2  ;;  %v405_v8 = vmul.f32 %v1748_v5, %v1748_v5 }
  0x9b   :  { %v1757_v15 = vsub.f32 %v1319_v12, %v278_v0  ;;  %v1760_v9 = vsub.f32 %v1324_v13, %v279_v1  ;;  %v476_v55 = vsel %vm78_vm0, %v404_v54, 0.0  ;;  %v479_v31 = vsel %vm78_vm0, %v405_v8, 0.0 }
  0x9c   :  { %474 = vadd.xlane.f32.xlu1 %v473_v62  ;;  %477 = vadd.xlane.f32.xlu0 %v476_v55  ;;  %v105_v30 = vpop.xlane.xlu0 %104  ;;  %v108_v38 = vpop.xlane.xlu1 %107 }
  0x9d   :  { %v280_v22 = vmul.f32 0.03125, %v105_v30  ;;  %v281_v23 = vmul.f32 0.03125, %v108_v38  ;;  %v406_v47 = vmul.f32 %v1757_v15, %v1757_v15  ;;  %v407_v12 = vmul.f32 %v1760_v9, %v1760_v9 }
  0x9f   :  { %v1769_v0 = vsub.f32 %v1333_v16, %v280_v22  ;;  %v1772_v13 = vsub.f32 %v1338_v17, %v281_v23  ;;  %v482_v62 = vsel %vm78_vm0, %v406_v47, 0.0  ;;  %v485_v8 = vsel %vm78_vm0, %v407_v12, 0.0 }
  0xa0   :  { %480 = vadd.xlane.f32.xlu1 %v479_v31  ;;  %483 = vadd.xlane.f32.xlu0 %v482_v62  ;;  %v111_v1 = vpop.xlane.xlu0 %110  ;;  %v114_v54 = vpop.xlane.xlu1 %113 }
  0xa1   :  { %v282_v55 = vmul.f32 0.03125, %v111_v1  ;;  %v283_v30 = vmul.f32 0.03125, %v114_v54  ;;  %v408_v38 = vmul.f32 %v1769_v0, %v1769_v0  ;;  %v409_v16 = vmul.f32 %v1772_v13, %v1772_v13 }
  0xa3   :  { %v1781_v22 = vsub.f32 %v1347_v20, %v282_v55  ;;  %v1784_v17 = vsub.f32 %v1352_v21, %v283_v30  ;;  %v488_v31 = vsel %vm78_vm0, %v408_v38, 0.0  ;;  %v491_v12 = vsel %vm78_vm0, %v409_v16, 0.0 }
  0xa4   :  { %486 = vadd.xlane.f32.xlu1 %v485_v8  ;;  %489 = vadd.xlane.f32.xlu0 %v488_v31  ;;  %v117_v23 = vpop.xlane.xlu0 %116  ;;  %v120_v47 = vpop.xlane.xlu1 %119 }
  0xa5   :  { %v284_v62 = vmul.f32 0.03125, %v117_v23  ;;  %v285_v1 = vmul.f32 0.03125, %v120_v47  ;;  %v410_v54 = vmul.f32 %v1781_v22, %v1781_v22  ;;  %v411_v20 = vmul.f32 %v1784_v17, %v1784_v17 }
  0xa7   :  { %v1793_v55 = vsub.f32 %v1361_v24, %v284_v62  ;;  %v1796_v21 = vsub.f32 %v1366_v25, %v285_v1  ;;  %v494_v8 = vsel %vm78_vm0, %v410_v54, 0.0  ;;  %v497_v16 = vsel %vm78_vm0, %v411_v20, 0.0 }
  0xa8   :  { %492 = vadd.xlane.f32.xlu1 %v491_v12  ;;  %495 = vadd.xlane.f32.xlu0 %v494_v8  ;;  %v123_v30 = vpop.xlane.xlu0 %122  ;;  %v126_v38 = vpop.xlane.xlu1 %125 }
  0xa9   :  { %v286_v31 = vmul.f32 0.03125, %v123_v30  ;;  %v287_v23 = vmul.f32 0.03125, %v126_v38  ;;  %v412_v47 = vmul.f32 %v1793_v55, %v1793_v55  ;;  %v413_v24 = vmul.f32 %v1796_v21, %v1796_v21 }
  0xab   :  { %v1805_v62 = vsub.f32 %v1375_v28, %v286_v31  ;;  %v1808_v25 = vsub.f32 %v1380_v29, %v287_v23  ;;  %v500_v12 = vsel %vm78_vm0, %v412_v47, 0.0  ;;  %v503_v20 = vsel %vm78_vm0, %v413_v24, 0.0 }
  0xac   :  { %498 = vadd.xlane.f32.xlu1 %v497_v16  ;;  %501 = vadd.xlane.f32.xlu0 %v500_v12  ;;  %v129_v1 = vpop.xlane.xlu0 %128  ;;  %v132_v54 = vpop.xlane.xlu1 %131 }
  0xad   :  { %v288_v8 = vmul.f32 0.03125, %v129_v1  ;;  %v289_v30 = vmul.f32 0.03125, %v132_v54  ;;  %v414_v38 = vmul.f32 %v1805_v62, %v1805_v62  ;;  %v415_v28 = vmul.f32 %v1808_v25, %v1808_v25 }
  0xaf   :  { %v1817_v31 = vsub.f32 %v1389_v32, %v288_v8  ;;  %v1820_v29 = vsub.f32 %v1394_v33, %v289_v30  ;;  %v506_v16 = vsel %vm78_vm0, %v414_v38, 0.0  ;;  %v509_v24 = vsel %vm78_vm0, %v415_v28, 0.0 }
  0xb0   :  { %504 = vadd.xlane.f32.xlu1 %v503_v20  ;;  %507 = vadd.xlane.f32.xlu0 %v506_v16  ;;  %v135_v23 = vpop.xlane.xlu0 %134  ;;  %v138_v47 = vpop.xlane.xlu1 %137 }
  0xb1   :  { %v290_v12 = vmul.f32 0.03125, %v135_v23  ;;  %v291_v1 = vmul.f32 0.03125, %v138_v47  ;;  %v416_v54 = vmul.f32 %v1817_v31, %v1817_v31  ;;  %v417_v32 = vmul.f32 %v1820_v29, %v1820_v29 }
  0xb3   :  { %v1829_v8 = vsub.f32 %v1403_v36, %v290_v12  ;;  %v1832_v33 = vsub.f32 %v1408_v37, %v291_v1  ;;  %v512_v20 = vsel %vm78_vm0, %v416_v54, 0.0  ;;  %v515_v28 = vsel %vm78_vm0, %v417_v32, 0.0 }
  0xb4   :  { %510 = vadd.xlane.f32.xlu1 %v509_v24  ;;  %513 = vadd.xlane.f32.xlu0 %v512_v20  ;;  %v141_v30 = vpop.xlane.xlu0 %140  ;;  %v144_v38 = vpop.xlane.xlu1 %143 }
  0xb5   :  { %v292_v16 = vmul.f32 0.03125, %v141_v30  ;;  %v293_v23 = vmul.f32 0.03125, %v144_v38  ;;  %v418_v47 = vmul.f32 %v1829_v8, %v1829_v8  ;;  %v419_v36 = vmul.f32 %v1832_v33, %v1832_v33 }
  0xb7   :  { %v1841_v12 = vsub.f32 %v1417_v40, %v292_v16  ;;  %v1844_v37 = vsub.f32 %v1422_v41, %v293_v23  ;;  %v518_v24 = vsel %vm78_vm0, %v418_v47, 0.0  ;;  %v521_v32 = vsel %vm78_vm0, %v419_v36, 0.0 }
  0xb8   :  { %516 = vadd.xlane.f32.xlu1 %v515_v28  ;;  %519 = vadd.xlane.f32.xlu0 %v518_v24  ;;  %v147_v1 = vpop.xlane.xlu0 %146  ;;  %v150_v54 = vpop.xlane.xlu1 %149 }
  0xb9   :  { %v294_v20 = vmul.f32 0.03125, %v147_v1  ;;  %v295_v30 = vmul.f32 0.03125, %v150_v54  ;;  %v420_v38 = vmul.f32 %v1841_v12, %v1841_v12  ;;  %v421_v40 = vmul.f32 %v1844_v37, %v1844_v37 }
  0xbb   :  { %v1853_v16 = vsub.f32 %v1431_v44, %v294_v20  ;;  %v1856_v41 = vsub.f32 %v1436_v45, %v295_v30  ;;  %v524_v28 = vsel %vm78_vm0, %v420_v38, 0.0  ;;  %v527_v36 = vsel %vm78_vm0, %v421_v40, 0.0 }
  0xbc   :  { %522 = vadd.xlane.f32.xlu1 %v521_v32  ;;  %525 = vadd.xlane.f32.xlu0 %v524_v28  ;;  %v153_v23 = vpop.xlane.xlu0 %152  ;;  %v156_v47 = vpop.xlane.xlu1 %155 }
  0xbd   :  { %v296_v24 = vmul.f32 0.03125, %v153_v23  ;;  %v297_v1 = vmul.f32 0.03125, %v156_v47  ;;  %v422_v54 = vmul.f32 %v1853_v16, %v1853_v16  ;;  %v423_v44 = vmul.f32 %v1856_v41, %v1856_v41 }
  0xbf   :  { %v1865_v20 = vsub.f32 %v1445_v48, %v296_v24  ;;  %v1868_v45 = vsub.f32 %v1450_v49, %v297_v1  ;;  %v530_v32 = vsel %vm78_vm0, %v422_v54, 0.0  ;;  %v533_v40 = vsel %vm78_vm0, %v423_v44, 0.0 }
  0xc0   :  { %528 = vadd.xlane.f32.xlu1 %v527_v36  ;;  %531 = vadd.xlane.f32.xlu0 %v530_v32  ;;  %v159_v30 = vpop.xlane.xlu0 %158  ;;  %v162_v38 = vpop.xlane.xlu1 %161 }
  0xc1   :  { %v298_v28 = vmul.f32 0.03125, %v159_v30  ;;  %v299_v23 = vmul.f32 0.03125, %v162_v38  ;;  %v424_v47 = vmul.f32 %v1865_v20, %v1865_v20  ;;  %v425_v48 = vmul.f32 %v1868_v45, %v1868_v45 }
  0xc3   :  { %v1877_v24 = vsub.f32 %v1459_v52, %v298_v28  ;;  %v1880_v49 = vsub.f32 %v1464_v53, %v299_v23  ;;  %v536_v36 = vsel %vm78_vm0, %v424_v47, 0.0  ;;  %v539_v44 = vsel %vm78_vm0, %v425_v48, 0.0 }
  0xc4   :  { %534 = vadd.xlane.f32.xlu1 %v533_v40  ;;  %537 = vadd.xlane.f32.xlu0 %v536_v36  ;;  %v165_v1 = vpop.xlane.xlu0 %164  ;;  %v168_v54 = vpop.xlane.xlu1 %167 }
  0xc5   :  { %v300_v32 = vmul.f32 0.03125, %v165_v1  ;;  %v301_v30 = vmul.f32 0.03125, %v168_v54  ;;  %v426_v38 = vmul.f32 %v1877_v24, %v1877_v24  ;;  %v427_v52 = vmul.f32 %v1880_v49, %v1880_v49 }
  0xc7   :  { %v1889_v28 = vsub.f32 %v1473_v56, %v300_v32  ;;  %v1892_v53 = vsub.f32 %v1478_v57, %v301_v30  ;;  %v542_v40 = vsel %vm78_vm0, %v426_v38, 0.0  ;;  %v545_v48 = vsel %vm78_vm0, %v427_v52, 0.0 }
  0xc8   :  { %540 = vadd.xlane.f32.xlu1 %v539_v44  ;;  %543 = vadd.xlane.f32.xlu0 %v542_v40  ;;  %v171_v23 = vpop.xlane.xlu0 %170  ;;  %v174_v47 = vpop.xlane.xlu1 %173 }
  0xc9   :  { %v302_v36 = vmul.f32 0.03125, %v171_v23  ;;  %v303_v1 = vmul.f32 0.03125, %v174_v47  ;;  %v428_v54 = vmul.f32 %v1889_v28, %v1889_v28  ;;  %v429_v56 = vmul.f32 %v1892_v53, %v1892_v53 }
  0xcb   :  { %v1901_v32 = vsub.f32 %v1487_v60, %v302_v36  ;;  %v1904_v57 = vsub.f32 %v1492_v61, %v303_v1  ;;  %v548_v44 = vsel %vm78_vm0, %v428_v54, 0.0  ;;  %v551_v52 = vsel %vm78_vm0, %v429_v56, 0.0 }
  0xcc   :  { %546 = vadd.xlane.f32.xlu1 %v545_v48  ;;  %549 = vadd.xlane.f32.xlu0 %v548_v44  ;;  %v177_v30 = vpop.xlane.xlu0 %176  ;;  %v180_v38 = vpop.xlane.xlu1 %179 }
  0xcd   :  { %v304_v40 = vmul.f32 0.03125, %v177_v30  ;;  %v305_v23 = vmul.f32 0.03125, %v180_v38  ;;  %v430_v47 = vmul.f32 %v1901_v32, %v1901_v32  ;;  %v431_v60 = vmul.f32 %v1904_v57, %v1904_v57 }
  0xcf   :  { %v1913_v36 = vsub.f32 %v1501_v3, %v304_v40  ;;  %v1916_v61 = vsub.f32 %v1506_v4, %v305_v23  ;;  %v554_v48 = vsel %vm78_vm0, %v430_v47, 0.0  ;;  %v557_v56 = vsel %vm78_vm0, %v431_v60, 0.0 }
  0xd0   :  { %552 = vadd.xlane.f32.xlu1 %v551_v52  ;;  %555 = vadd.xlane.f32.xlu0 %v554_v48  ;;  %v183_v1 = vpop.xlane.xlu0 %182  ;;  %v186_v54 = vpop.xlane.xlu1 %185 }
  0xd1   :  { %v306_v44 = vmul.f32 0.03125, %v183_v1  ;;  %v307_v30 = vmul.f32 0.03125, %v186_v54  ;;  %v432_v38 = vmul.f32 %v1913_v36, %v1913_v36  ;;  %v433_v3 = vmul.f32 %v1916_v61, %v1916_v61 }
  0xd3   :  { %v1925_v40 = vsub.f32 %v1515_v10, %v306_v44  ;;  %v1928_v4 = vsub.f32 %v1520_v11, %v307_v30  ;;  %v560_v52 = vsel %vm78_vm0, %v432_v38, 0.0  ;;  %v563_v60 = vsel %vm78_vm0, %v433_v3, 0.0 }
  0xd4   :  { %558 = vadd.xlane.f32.xlu1 %v557_v56  ;;  %561 = vadd.xlane.f32.xlu0 %v560_v52  ;;  %v189_v23 = vpop.xlane.xlu0 %188  ;;  %v192_v47 = vpop.xlane.xlu1 %191 }
  0xd5   :  { %v308_v48 = vmul.f32 0.03125, %v189_v23  ;;  %v309_v1 = vmul.f32 0.03125, %v192_v47  ;;  %v434_v54 = vmul.f32 %v1925_v40, %v1925_v40  ;;  %v435_v10 = vmul.f32 %v1928_v4, %v1928_v4 }
  0xd7   :  { %v1937_v44 = vsub.f32 %v1529_v18, %v308_v48  ;;  %v1940_v11 = vsub.f32 %v1534_v19, %v309_v1  ;;  %v566_v56 = vsel %vm78_vm0, %v434_v54, 0.0  ;;  %v569_v3 = vsel %vm78_vm0, %v435_v10, 0.0 }
  0xd8   :  { %564 = vadd.xlane.f32.xlu1 %v563_v60  ;;  %567 = vadd.xlane.f32.xlu0 %v566_v56  ;;  %v195_v30 = vpop.xlane.xlu0 %194  ;;  %v198_v38 = vpop.xlane.xlu1 %197 }
  0xd9   :  { %v310_v52 = vmul.f32 0.03125, %v195_v30  ;;  %v311_v23 = vmul.f32 0.03125, %v198_v38  ;;  %v436_v47 = vmul.f32 %v1937_v44, %v1937_v44  ;;  %v437_v18 = vmul.f32 %v1940_v11, %v1940_v11 }
  0xdb   :  { %v1949_v48 = vsub.f32 %v1543_v26, %v310_v52  ;;  %v1952_v19 = vsub.f32 %v1548_v27, %v311_v23  ;;  %v572_v60 = vsel %vm78_vm0, %v436_v47, 0.0  ;;  %v575_v10 = vsel %vm78_vm0, %v437_v18, 0.0 }
  0xdc   :  { %570 = vadd.xlane.f32.xlu1 %v569_v3  ;;  %573 = vadd.xlane.f32.xlu0 %v572_v60  ;;  %v201_v1 = vpop.xlane.xlu0 %200  ;;  %v204_v54 = vpop.xlane.xlu1 %203 }
  0xdd   :  { %v312_v56 = vmul.f32 0.03125, %v201_v1  ;;  %v313_v30 = vmul.f32 0.03125, %v204_v54  ;;  %v438_v38 = vmul.f32 %v1949_v48, %v1949_v48  ;;  %v439_v26 = vmul.f32 %v1952_v19, %v1952_v19 }
  0xdf   :  { %v1961_v52 = vsub.f32 %v1557_v34, %v312_v56  ;;  %v1964_v27 = vsub.f32 %v1562_v35, %v313_v30  ;;  %v578_v3 = vsel %vm78_vm0, %v438_v38, 0.0  ;;  %v581_v18 = vsel %vm78_vm0, %v439_v26, 0.0 }
  0xe0   :  { %576 = vadd.xlane.f32.xlu1 %v575_v10  ;;  %579 = vadd.xlane.f32.xlu0 %v578_v3  ;;  %v207_v23 = vpop.xlane.xlu0 %206  ;;  %v210_v47 = vpop.xlane.xlu1 %209 }
  0xe1   :  { %v314_v60 = vmul.f32 0.03125, %v207_v23  ;;  %v315_v1 = vmul.f32 0.03125, %v210_v47  ;;  %v440_v54 = vmul.f32 %v1961_v52, %v1961_v52  ;;  %v441_v34 = vmul.f32 %v1964_v27, %v1964_v27 }
  0xe3   :  { %v1973_v56 = vsub.f32 %v1571_v42, %v314_v60  ;;  %v1976_v35 = vsub.f32 %v1576_v43, %v315_v1  ;;  %v584_v10 = vsel %vm78_vm0, %v440_v54, 0.0  ;;  %v587_v26 = vsel %vm78_vm0, %v441_v34, 0.0 }
  0xe4   :  { %582 = vadd.xlane.f32.xlu1 %v581_v18  ;;  %585 = vadd.xlane.f32.xlu0 %v584_v10  ;;  %v213_v30 = vpop.xlane.xlu0 %212  ;;  %v216_v38 = vpop.xlane.xlu1 %215 }
  0xe5   :  { %v316_v3 = vmul.f32 0.03125, %v213_v30  ;;  %v317_v23 = vmul.f32 0.03125, %v216_v38  ;;  %v442_v47 = vmul.f32 %v1973_v56, %v1973_v56  ;;  %v443_v42 = vmul.f32 %v1976_v35, %v1976_v35 }
  0xe7   :  { %v1985_v60 = vsub.f32 %v1585_v50, %v316_v3  ;;  %v1988_v43 = vsub.f32 %v1590_v51, %v317_v23  ;;  %v590_v18 = vsel %vm78_vm0, %v442_v47, 0.0  ;;  %v593_v34 = vsel %vm78_vm0, %v443_v42, 0.0 }
  0xe8   :  { %588 = vadd.xlane.f32.xlu1 %v587_v26  ;;  %591 = vadd.xlane.f32.xlu0 %v590_v18  ;;  %v219_v1 = vpop.xlane.xlu0 %218  ;;  %v222_v54 = vpop.xlane.xlu1 %221 }
  0xe9   :  { %v318_v10 = vmul.f32 0.03125, %v219_v1  ;;  %v319_v30 = vmul.f32 0.03125, %v222_v54  ;;  %v444_v38 = vmul.f32 %v1985_v60, %v1985_v60  ;;  %v445_v50 = vmul.f32 %v1988_v43, %v1988_v43 }
  0xeb   :  { %v1997_v3 = vsub.f32 %v1599_v58, %v318_v10  ;;  %v2000_v51 = vsub.f32 %v1604_v59, %v319_v30  ;;  %v596_v26 = vsel %vm78_vm0, %v444_v38, 0.0  ;;  %v599_v42 = vsel %vm78_vm0, %v445_v50, 0.0 }
  0xec   :  { %594 = vadd.xlane.f32.xlu1 %v593_v34  ;;  %597 = vadd.xlane.f32.xlu0 %v596_v26  ;;  %v225_v23 = vpop.xlane.xlu0 %224  ;;  %v228_v47 = vpop.xlane.xlu1 %227 }
  0xed   :  { %2606 = vst [vmem:[#allocation16_spill] sm:$0xff] %v1997_v3  ;;  %2607 = vst [vmem:[#allocation17_spill] sm:$0xff] %v2000_v51  ;;  %v320_v18 = vmul.f32 0.03125, %v225_v23  ;;  %v321_v1 = vmul.f32 0.03125, %v228_v47  ;;  %v446_v54 = vmul.f32 %v1997_v3, %v1997_v3  ;;  %v447_v58 = vmul.f32 %v2000_v51, %v2000_v51 }
  0xef   :  { %v2009_v10 = vsub.f32 %v1613_v6, %v320_v18  ;;  %v2012_v59 = vsub.f32 %v1618_v7, %v321_v1  ;;  %v602_v34 = vsel %vm78_vm0, %v446_v54, 0.0  ;;  %v605_v50 = vsel %vm78_vm0, %v447_v58, 0.0  ;;  %v2610_v18 = vld [vmem:[#allocation2_spill] sm:$0xff]  ;;  %v2612_v7 = vld [vmem:[#allocation3_spill] sm:$0xff] }
  0xf0   :  { %600 = vadd.xlane.f32.xlu1 %v599_v42  ;;  %603 = vadd.xlane.f32.xlu0 %v602_v34  ;;  %v231_v30 = vpop.xlane.xlu0 %230  ;;  %v234_v38 = vpop.xlane.xlu1 %233 }
  0xf1   :  { %2608 = vst [vmem:[#allocation18_spill] sm:$0xff] %v2009_v10  ;;  %2609 = vst [vmem:[#allocation19_spill] sm:$0xff] %v2012_v59  ;;  %v322_v26 = vmul.f32 0.03125, %v231_v30  ;;  %v323_v23 = vmul.f32 0.03125, %v234_v38  ;;  %v448_v47 = vmul.f32 %v2009_v10, %v2009_v10  ;;  %v449_v6 = vmul.f32 %v2012_v59, %v2012_v59 }
  0xf3   :  { %v2021_v51 = vsub.f32 %v2610_v18, %v322_v26  ;;  %v2024_v1 = vsub.f32 %v2612_v7, %v323_v23  ;;  %v608_v42 = vsel %vm78_vm0, %v448_v47, 0.0  ;;  %v611_v34 = vsel %vm78_vm0, %v449_v6, 0.0  ;;  %v2614_v18 = vld [vmem:[#allocation4_spill] sm:$0xff]  ;;  %v2616_v23 = vld [vmem:[#allocation5_spill] sm:$0xff] }
  0xf4   :  { %606 = vadd.xlane.f32.xlu1 %v605_v50  ;;  %609 = vadd.xlane.f32.xlu0 %v608_v42  ;;  %v237_v54 = vpop.xlane.xlu0 %236  ;;  %v240_v58 = vpop.xlane.xlu1 %239 }
  0xf5   :  { %2611 = vst [vmem:[#allocation2_spill] sm:$0xff] %v2021_v51  ;;  %2613 = vst [vmem:[#allocation3_spill] sm:$0xff] %v2024_v1  ;;  %v324_v30 = vmul.f32 0.03125, %v237_v54  ;;  %v325_v38 = vmul.f32 0.03125, %v240_v58  ;;  %v450_v10 = vmul.f32 %v2021_v51, %v2021_v51  ;;  %v451_v26 = vmul.f32 %v2024_v1, %v2024_v1 }
  0xf7   :  { %v2033_v59 = vsub.f32 %v2614_v18, %v324_v30  ;;  %v2036_v7 = vsub.f32 %v2616_v23, %v325_v38  ;;  %v614_v50 = vsel %vm78_vm0, %v450_v10, 0.0  ;;  %v617_v42 = vsel %vm78_vm0, %v451_v26, 0.0  ;;  %v2618_v18 = vld [vmem:[#allocation6_spill] sm:$0xff]  ;;  %v2620_v38 = vld [vmem:[#allocation7_spill] sm:$0xff] }
  0xf8   :  { %612 = vadd.xlane.f32.xlu1 %v611_v34  ;;  %615 = vadd.xlane.f32.xlu0 %v614_v50  ;;  %v243_v47 = vpop.xlane.xlu0 %242  ;;  %v246_v6 = vpop.xlane.xlu1 %245 }
  0xf9   :  { %2615 = vst [vmem:[#allocation4_spill] sm:$0xff] %v2033_v59  ;;  %2617 = vst [vmem:[#allocation5_spill] sm:$0xff] %v2036_v7  ;;  %v326_v54 = vmul.f32 0.03125, %v243_v47  ;;  %v327_v58 = vmul.f32 0.03125, %v246_v6  ;;  %v452_v51 = vmul.f32 %v2033_v59, %v2033_v59  ;;  %v453_v30 = vmul.f32 %v2036_v7, %v2036_v7 }
  0xfb   :  { %v2045_v1 = vsub.f32 %v2618_v18, %v326_v54  ;;  %v2048_v23 = vsub.f32 %v2620_v38, %v327_v58  ;;  %v620_v10 = vsel %vm78_vm0, %v452_v51, 0.0  ;;  %v623_v50 = vsel %vm78_vm0, %v453_v30, 0.0  ;;  %v2622_v18 = vld [vmem:[#allocation8_spill] sm:$0xff]  ;;  %v2624_v58 = vld [vmem:[#allocation9_spill] sm:$0xff] }
  0xfc   :  { %618 = vadd.xlane.f32.xlu1 %v617_v42  ;;  %621 = vadd.xlane.f32.xlu0 %v620_v10  ;;  %v249_v34 = vpop.xlane.xlu0 %248  ;;  %v252_v26 = vpop.xlane.xlu1 %251 }
  0xfd   :  { %2619 = vst [vmem:[#allocation6_spill] sm:$0xff] %v2045_v1  ;;  %2621 = vst [vmem:[#allocation7_spill] sm:$0xff] %v2048_v23  ;;  %v328_v47 = vmul.f32 0.03125, %v249_v34  ;;  %v329_v6 = vmul.f32 0.03125, %v252_v26  ;;  %v454_v59 = vmul.f32 %v2045_v1, %v2045_v1  ;;  %v455_v54 = vmul.f32 %v2048_v23, %v2048_v23 }
  0xff   :  { %v2057_v7 = vsub.f32 %v2622_v18, %v328_v47  ;;  %v2060_v38 = vsub.f32 %v2624_v58, %v329_v6  ;;  %v626_v51 = vsel %vm78_vm0, %v454_v59, 0.0  ;;  %v629_v10 = vsel %vm78_vm0, %v455_v54, 0.0  ;;  %v2626_v18 = vld [vmem:[#allocation10_spill] sm:$0xff]  ;;  %v2628_v6 = vld [vmem:[#allocation11_spill] sm:$0xff] }
 0x100   :  { %624 = vadd.xlane.f32.xlu1 %v623_v50  ;;  %627 = vadd.xlane.f32.xlu0 %v626_v51  ;;  %v255_v42 = vpop.xlane.xlu0 %254  ;;  %v258_v30 = vpop.xlane.xlu1 %257 }
 0x101   :  { %2623 = vst [vmem:[#allocation8_spill] sm:$0xff] %v2057_v7  ;;  %2625 = vst [vmem:[#allocation9_spill] sm:$0xff] %v2060_v38  ;;  %v330_v34 = vmul.f32 0.03125, %v255_v42  ;;  %v331_v26 = vmul.f32 0.03125, %v258_v30  ;;  %v456_v1 = vmul.f32 %v2057_v7, %v2057_v7  ;;  %v457_v47 = vmul.f32 %v2060_v38, %v2060_v38 }
 0x103   :  { %v2069_v23 = vsub.f32 %v2626_v18, %v330_v34  ;;  %v2072_v58 = vsub.f32 %v2628_v6, %v331_v26  ;;  %v632_v59 = vsel %vm78_vm0, %v456_v1, 0.0  ;;  %v635_v51 = vsel %vm78_vm0, %v457_v47, 0.0  ;;  %v2630_v18 = vld [vmem:[#allocation12_spill] sm:$0xff]  ;;  %v2632_v26 = vld [vmem:[#allocation13_spill] sm:$0xff] }
 0x104   :  { %630 = vadd.xlane.f32.xlu1 %v629_v10  ;;  %633 = vadd.xlane.f32.xlu0 %v632_v59  ;;  %v261_v50 = vpop.xlane.xlu0 %260  ;;  %v264_v54 = vpop.xlane.xlu1 %263 }
 0x105   :  { %2627 = vst [vmem:[#allocation10_spill] sm:$0xff] %v2069_v23  ;;  %2629 = vst [vmem:[#allocation11_spill] sm:$0xff] %v2072_v58  ;;  %v332_v42 = vmul.f32 0.03125, %v261_v50  ;;  %v333_v30 = vmul.f32 0.03125, %v264_v54  ;;  %v458_v7 = vmul.f32 %v2069_v23, %v2069_v23  ;;  %v459_v34 = vmul.f32 %v2072_v58, %v2072_v58 }
 0x107   :  { %v2081_v38 = vsub.f32 %v2630_v18, %v332_v42  ;;  %v2084_v6 = vsub.f32 %v2632_v26, %v333_v30  ;;  %v638_v1 = vsel %vm78_vm0, %v458_v7, 0.0  ;;  %v641_v59 = vsel %vm78_vm0, %v459_v34, 0.0  ;;  %v2634_v18 = vld [vmem:[#allocation14_spill] sm:$0xff] }
 0x108   :  { %636 = vadd.xlane.f32.xlu1 %v635_v51  ;;  %639 = vadd.xlane.f32.xlu0 %v638_v1  ;;  %v267_v10 = vpop.xlane.xlu0 %266  ;;  %v270_v47 = vpop.xlane.xlu1 %269 }
 0x109   :  { %2631 = vst [vmem:[#allocation12_spill] sm:$0xff] %v2081_v38  ;;  %2633 = vst [vmem:[#allocation13_spill] sm:$0xff] %v2084_v6  ;;  %v334_v50 = vmul.f32 0.03125, %v267_v10  ;;  %v335_v54 = vmul.f32 0.03125, %v270_v47  ;;  %v460_v23 = vmul.f32 %v2081_v38, %v2081_v38  ;;  %v461_v42 = vmul.f32 %v2084_v6, %v2084_v6 }
 0x10b   :  { %v2093_v58 = vsub.f32 %v2634_v18, %v334_v50  ;;  %v2096_v30 = vsub.f32 %v1716_v46, %v335_v54  ;;  %v644_v7 = vsel %vm78_vm0, %v460_v23, 0.0  ;;  %v647_v51 = vsel %vm78_vm0, %v461_v42, 0.0 }
 0x10c   :  { %642 = vadd.xlane.f32.xlu1 %v641_v59  ;;  %645 = vadd.xlane.f32.xlu0 %v644_v7 }
 0x10d   :  { %2635 = vst [vmem:[#allocation14_spill] sm:$0xff] %v2093_v58  ;;  %2636 = vst [vmem:[#allocation20_spill] sm:$0xff] %v2096_v30  ;;  %v462_v34 = vmul.f32 %v2093_v58, %v2093_v58  ;;  %v463_v26 = vmul.f32 %v2096_v30, %v2096_v30 }
 0x10f   :  { %v650_v1 = vsel %vm78_vm0, %v462_v34, 0.0  ;;  %v653_v10 = vsel %vm78_vm0, %v463_v26, 0.0 }
 0x110   :  { %648 = vadd.xlane.f32.xlu1 %v647_v51  ;;  %651 = vadd.xlane.f32.xlu0 %v650_v1 }
 0x114   :  { %654 = vadd.xlane.f32.xlu1 %v653_v10 }
 0x11d   :  { %v466_v46 = vpop.xlane.xlu0 %465 }
 0x11e   :  { %v656_v47 = vmul.f32 0.03125, %v466_v46 }
 0x120   :  { %v720_v23 = vadd.f32 1e-05, %v656_v47 }
 0x121   :  { %v469_v59 = vpop.xlane.xlu1 %468  ;;  %v472_v50 = vpop.xlane.xlu0 %471 }
 0x122   :  { %1124 = vrsqrt.f32 %v720_v23  ;;  %v657_v54 = vmul.f32 0.03125, %v469_v59  ;;  %v658_v42 = vmul.f32 0.03125, %v472_v50 }
 0x124   :  { %v721_v18 = vadd.f32 1e-05, %v657_v54  ;;  %v722_v7 = vadd.f32 1e-05, %v658_v42 }
 0x125   :  { %v475_v58 = vpop.xlane.xlu1 %474  ;;  %v478_v6 = vpop.xlane.xlu0 %477 }
 0x126   :  { %1126 = vrsqrt.f32 %v721_v18  ;;  %v659_v30 = vmul.f32 0.03125, %v475_v58  ;;  %v660_v34 = vmul.f32 0.03125, %v478_v6  ;;  %v2109_v58 = vld [vmem:[%s2557_s1] ss:$0 sm:$0xff] }
 0x127   :  { %1128 = vrsqrt.f32 %v722_v7  ;;  %v2115_v7 = vld [vmem:[%s2558_s2] ss:$0 sm:$0xff] }
 0x128   :  { %v723_v51 = vadd.f32 1e-05, %v659_v30  ;;  %v724_v1 = vadd.f32 1e-05, %v660_v34 }
 0x129   :  { %v481_v26 = vpop.xlane.xlu1 %480  ;;  %v484_v10 = vpop.xlane.xlu0 %483 }
 0x12a   :  { %1130 = vrsqrt.f32 %v723_v51  ;;  %v661_v46 = vmul.f32 0.03125, %v481_v26  ;;  %v662_v47 = vmul.f32 0.03125, %v484_v10 }
 0x12b   :  { %1132 = vrsqrt.f32 %v724_v1 }
 0x12c   :  { %v725_v38 = vadd.f32 1e-05, %v661_v46  ;;  %v726_v23 = vadd.f32 1e-05, %v662_v47 }
 0x12d   :  { %v487_v59 = vpop.xlane.xlu1 %486  ;;  %v490_v50 = vpop.xlane.xlu0 %489 }
 0x12e   :  { %1134 = vrsqrt.f32 %v725_v38  ;;  %v663_v54 = vmul.f32 0.03125, %v487_v59  ;;  %v664_v42 = vmul.f32 0.03125, %v490_v50  ;;  %v2637_v59 = vld [vmem:[#allocation15_spill] sm:$0xff] }
 0x12f   :  { %v1125_v3 = vpop.eup %1124  ;;  %1136 = vrsqrt.f32 %v726_v23 }
 0x130   :  { %v850_v6 = vmul.f32 %v1125_v3, %v1723_v39  ;;  %v727_v30 = vadd.f32 1e-05, %v663_v54  ;;  %v728_v18 = vadd.f32 1e-05, %v664_v42 }
 0x131   :  { %v493_v34 = vpop.xlane.xlu1 %492  ;;  %v496_v38 = vpop.xlane.xlu0 %495 }
 0x132   :  { %v920_v51 = vmul.f32 %v2109_v58, %v850_v6  ;;  %1138 = vrsqrt.f32 %v727_v30  ;;  %v665_v1 = vmul.f32 0.03125, %v493_v34  ;;  %v666_v26 = vmul.f32 0.03125, %v496_v38 }
 0x133   :  { %v1127_v10 = vpop.eup %1126  ;;  %1140 = vrsqrt.f32 %v728_v18 }
 0x134   :  { %v1129_v46 = vpop.eup %1128  ;;  %v990_v47 = vadd.f32 %v2115_v7, %v920_v51  ;;  %v851_v39 = vmul.f32 %v1127_v10, %v1733_v63  ;;  %v729_v3 = vadd.f32 1e-05, %v665_v1  ;;  %v730_v23 = vadd.f32 1e-05, %v666_v26 }
 0x135   :  { %v852_v50 = vmul.f32 %v1129_v46, %v2637_v59  ;;  %v499_v54 = vpop.xlane.xlu1 %498  ;;  %v502_v42 = vpop.xlane.xlu0 %501 }
 0x136   :  { %1054 = vst.msk [vmem:[%s2559_s3] sm:$0xff] %vm78_vm0, %v990_v47  ;;  %v921_v6 = vmul.f32 %v2109_v58, %v851_v39  ;;  %1142 = vrsqrt.f32 %v729_v3  ;;  %v667_v30 = vmul.f32 0.03125, %v499_v54  ;;  %v668_v18 = vmul.f32 0.03125, %v502_v42 }
 0x137   :  { %v1131_v34 = vpop.eup %1130  ;;  %v922_v38 = vmul.f32 %v2109_v58, %v852_v50  ;;  %1144 = vrsqrt.f32 %v730_v23 }
 0x138   :  { %v1133_v63 = vpop.eup %1132  ;;  %v991_v51 = vadd.f32 %v2115_v7, %v921_v6  ;;  %v853_v1 = vmul.f32 %v1131_v34, %v1736_v14  ;;  %v731_v26 = vadd.f32 1e-05, %v667_v30  ;;  %v732_v10 = vadd.f32 1e-05, %v668_v18 }
 0x139   :  { %v992_v46 = vadd.f32 %v2115_v7, %v922_v38  ;;  %v854_v47 = vmul.f32 %v1133_v63, %v1745_v2  ;;  %v505_v59 = vpop.xlane.xlu1 %504  ;;  %v508_v39 = vpop.xlane.xlu0 %507 }
 0x13a   :  { %1055 = vst.msk [vmem:[%s2559_s3 + $0x8] sm:$0xff] %vm78_vm0, %v991_v51  ;;  %v923_v3 = vmul.f32 %v2109_v58, %v853_v1  ;;  %1146 = vrsqrt.f32 %v731_v26  ;;  %v669_v23 = vmul.f32 0.03125, %v505_v59  ;;  %v670_v50 = vmul.f32 0.03125, %v508_v39 }
 0x13b   :  { %v1135_v54 = vpop.eup %1134  ;;  %1056 = vst.msk [vmem:[%s2559_s3 + $0x10] sm:$0xff] %vm78_vm0, %v992_v46  ;;  %v924_v14 = vmul.f32 %v2109_v58, %v854_v47  ;;  %1148 = vrsqrt.f32 %v732_v10 }
 0x13c   :  { %v1137_v2 = vpop.eup %1136  ;;  %v993_v42 = vadd.f32 %v2115_v7, %v923_v3  ;;  %v855_v6 = vmul.f32 %v1135_v54, %v1748_v5  ;;  %v733_v30 = vadd.f32 1e-05, %v669_v23  ;;  %v734_v18 = vadd.f32 1e-05, %v670_v50 }
 0x13d   :  { %v994_v34 = vadd.f32 %v2115_v7, %v924_v14  ;;  %v856_v38 = vmul.f32 %v1137_v2, %v1757_v15  ;;  %v511_v63 = vpop.xlane.xlu1 %510  ;;  %v514_v51 = vpop.xlane.xlu0 %513 }
 0x13e   :  { %1057 = vst.msk [vmem:[%s2559_s3 + $0x18] sm:$0xff] %vm78_vm0, %v993_v42  ;;  %v925_v1 = vmul.f32 %v2109_v58, %v855_v6  ;;  %1150 = vrsqrt.f32 %v733_v30  ;;  %v671_v26 = vmul.f32 0.03125, %v511_v63  ;;  %v672_v10 = vmul.f32 0.03125, %v514_v51 }
 0x13f   :  { %v1139_v46 = vpop.eup %1138  ;;  %1058 = vst.msk [vmem:[%s2559_s3 + $0x20] sm:$0xff] %vm78_vm0, %v994_v34  ;;  %v926_v5 = vmul.f32 %v2109_v58, %v856_v38  ;;  %1152 = vrsqrt.f32 %v734_v18 }
 0x140   :  { %v1141_v15 = vpop.eup %1140  ;;  %v995_v47 = vadd.f32 %v2115_v7, %v925_v1  ;;  %v857_v59 = vmul.f32 %v1139_v46, %v1760_v9  ;;  %v735_v39 = vadd.f32 1e-05, %v671_v26  ;;  %v736_v3 = vadd.f32 1e-05, %v672_v10 }
 0x141   :  { %v996_v23 = vadd.f32 %v2115_v7, %v926_v5  ;;  %v858_v50 = vmul.f32 %v1141_v15, %v1769_v0  ;;  %v517_v54 = vpop.xlane.xlu1 %516  ;;  %v520_v14 = vpop.xlane.xlu0 %519 }
 0x142   :  { %1059 = vst.msk [vmem:[%s2559_s3 + $0x28] sm:$0xff] %vm78_vm0, %v995_v47  ;;  %v927_v2 = vmul.f32 %v2109_v58, %v857_v59  ;;  %1154 = vrsqrt.f32 %v735_v39  ;;  %v673_v42 = vmul.f32 0.03125, %v517_v54  ;;  %v674_v6 = vmul.f32 0.03125, %v520_v14 }
 0x143   :  { %v1143_v30 = vpop.eup %1142  ;;  %1060 = vst.msk [vmem:[%s2559_s3 + $0x30] sm:$0xff] %vm78_vm0, %v996_v23  ;;  %v928_v9 = vmul.f32 %v2109_v58, %v858_v50  ;;  %1156 = vrsqrt.f32 %v736_v3 }
 0x144   :  { %v1145_v0 = vpop.eup %1144  ;;  %v997_v18 = vadd.f32 %v2115_v7, %v927_v2  ;;  %v859_v34 = vmul.f32 %v1143_v30, %v1772_v13  ;;  %v737_v38 = vadd.f32 1e-05, %v673_v42  ;;  %v738_v63 = vadd.f32 1e-05, %v674_v6 }
 0x145   :  { %v998_v51 = vadd.f32 %v2115_v7, %v928_v9  ;;  %v860_v1 = vmul.f32 %v1145_v0, %v1781_v22  ;;  %v523_v26 = vpop.xlane.xlu1 %522  ;;  %v526_v10 = vpop.xlane.xlu0 %525 }
 0x146   :  { %1061 = vst.msk [vmem:[%s2559_s3 + $0x38] sm:$0xff] %vm78_vm0, %v997_v18  ;;  %v929_v46 = vmul.f32 %v2109_v58, %v859_v34  ;;  %1158 = vrsqrt.f32 %v737_v38  ;;  %v675_v5 = vmul.f32 0.03125, %v523_v26  ;;  %v676_v15 = vmul.f32 0.03125, %v526_v10 }
 0x147   :  { %v1147_v47 = vpop.eup %1146  ;;  %1062 = vst.msk [vmem:[%s2559_s3 + $0x40] sm:$0xff] %vm78_vm0, %v998_v51  ;;  %v930_v13 = vmul.f32 %v2109_v58, %v860_v1  ;;  %1160 = vrsqrt.f32 %v738_v63 }
 0x148   :  { %v1149_v22 = vpop.eup %1148  ;;  %v999_v59 = vadd.f32 %v2115_v7, %v929_v46  ;;  %v861_v39 = vmul.f32 %v1147_v47, %v1784_v17  ;;  %v739_v3 = vadd.f32 1e-05, %v675_v5  ;;  %v740_v23 = vadd.f32 1e-05, %v676_v15 }
 0x149   :  { %v1000_v50 = vadd.f32 %v2115_v7, %v930_v13  ;;  %v862_v54 = vmul.f32 %v1149_v22, %v1793_v55  ;;  %v529_v14 = vpop.xlane.xlu1 %528  ;;  %v532_v2 = vpop.xlane.xlu0 %531 }
 0x14a   :  { %1063 = vst.msk [vmem:[%s2559_s3 + $0x48] sm:$0xff] %vm78_vm0, %v999_v59  ;;  %v931_v42 = vmul.f32 %v2109_v58, %v861_v39  ;;  %1162 = vrsqrt.f32 %v739_v3  ;;  %v677_v6 = vmul.f32 0.03125, %v529_v14  ;;  %v678_v30 = vmul.f32 0.03125, %v532_v2 }
 0x14b   :  { %v1151_v9 = vpop.eup %1150  ;;  %1064 = vst.msk [vmem:[%s2559_s3 + $0x50] sm:$0xff] %vm78_vm0, %v1000_v50  ;;  %v932_v17 = vmul.f32 %v2109_v58, %v862_v54  ;;  %1164 = vrsqrt.f32 %v740_v23 }
 0x14c   :  { %v1153_v55 = vpop.eup %1152  ;;  %v1001_v0 = vadd.f32 %v2115_v7, %v931_v42  ;;  %v863_v18 = vmul.f32 %v1151_v9, %v1796_v21  ;;  %v741_v34 = vadd.f32 1e-05, %v677_v6  ;;  %v742_v38 = vadd.f32 1e-05, %v678_v30 }
 0x14d   :  { %v1002_v63 = vadd.f32 %v2115_v7, %v932_v17  ;;  %v864_v51 = vmul.f32 %v1153_v55, %v1805_v62  ;;  %v535_v1 = vpop.xlane.xlu1 %534  ;;  %v538_v26 = vpop.xlane.xlu0 %537 }
 0x14e   :  { %1065 = vst.msk [vmem:[%s2559_s3 + $0x58] sm:$0xff] %vm78_vm0, %v1001_v0  ;;  %v933_v10 = vmul.f32 %v2109_v58, %v863_v18  ;;  %1166 = vrsqrt.f32 %v741_v34  ;;  %v679_v46 = vmul.f32 0.03125, %v535_v1  ;;  %v680_v5 = vmul.f32 0.03125, %v538_v26 }
 0x14f   :  { %v1155_v15 = vpop.eup %1154  ;;  %1066 = vst.msk [vmem:[%s2559_s3 + $0x60] sm:$0xff] %vm78_vm0, %v1002_v63  ;;  %v934_v21 = vmul.f32 %v2109_v58, %v864_v51  ;;  %1168 = vrsqrt.f32 %v742_v38 }
 0x150   :  { %v1157_v62 = vpop.eup %1156  ;;  %v1003_v47 = vadd.f32 %v2115_v7, %v933_v10  ;;  %v865_v13 = vmul.f32 %v1155_v15, %v1808_v25  ;;  %v743_v22 = vadd.f32 1e-05, %v679_v46  ;;  %v744_v59 = vadd.f32 1e-05, %v680_v5 }
 0x151   :  { %v1004_v39 = vadd.f32 %v2115_v7, %v934_v21  ;;  %v866_v3 = vmul.f32 %v1157_v62, %v1817_v31  ;;  %v541_v23 = vpop.xlane.xlu1 %540  ;;  %v544_v50 = vpop.xlane.xlu0 %543 }
 0x152   :  { %1067 = vst.msk [vmem:[%s2559_s3 + $0x68] sm:$0xff] %vm78_vm0, %v1003_v47  ;;  %v935_v54 = vmul.f32 %v2109_v58, %v865_v13  ;;  %1170 = vrsqrt.f32 %v743_v22  ;;  %v681_v14 = vmul.f32 0.03125, %v541_v23  ;;  %v682_v2 = vmul.f32 0.03125, %v544_v50 }
 0x153   :  { %v1159_v42 = vpop.eup %1158  ;;  %1068 = vst.msk [vmem:[%s2559_s3 + $0x70] sm:$0xff] %vm78_vm0, %v1004_v39  ;;  %v936_v25 = vmul.f32 %v2109_v58, %v866_v3  ;;  %1172 = vrsqrt.f32 %v744_v59 }
 0x154   :  { %v1161_v31 = vpop.eup %1160  ;;  %v1005_v6 = vadd.f32 %v2115_v7, %v935_v54  ;;  %v867_v30 = vmul.f32 %v1159_v42, %v1820_v29  ;;  %v745_v9 = vadd.f32 1e-05, %v681_v14  ;;  %v746_v17 = vadd.f32 1e-05, %v682_v2 }
 0x155   :  { %v1006_v55 = vadd.f32 %v2115_v7, %v936_v25  ;;  %v868_v0 = vmul.f32 %v1161_v31, %v1829_v8  ;;  %v547_v18 = vpop.xlane.xlu1 %546  ;;  %v550_v34 = vpop.xlane.xlu0 %549 }
 0x156   :  { %1069 = vst.msk [vmem:[%s2559_s3 + $0x78] sm:$0xff] %vm78_vm0, %v1005_v6  ;;  %v937_v38 = vmul.f32 %v2109_v58, %v867_v30  ;;  %1174 = vrsqrt.f32 %v745_v9  ;;  %v683_v63 = vmul.f32 0.03125, %v547_v18  ;;  %v684_v51 = vmul.f32 0.03125, %v550_v34 }
 0x157   :  { %v1163_v1 = vpop.eup %1162  ;;  %1070 = vst.msk [vmem:[%s2559_s3 + $0x80] sm:$0xff] %vm78_vm0, %v1006_v55  ;;  %v938_v29 = vmul.f32 %v2109_v58, %v868_v0  ;;  %1176 = vrsqrt.f32 %v746_v17 }
 0x158   :  { %v1165_v8 = vpop.eup %1164  ;;  %v1007_v26 = vadd.f32 %v2115_v7, %v937_v38  ;;  %v869_v10 = vmul.f32 %v1163_v1, %v1832_v33  ;;  %v747_v46 = vadd.f32 1e-05, %v683_v63  ;;  %v748_v5 = vadd.f32 1e-05, %v684_v51 }
 0x159   :  { %v1008_v15 = vadd.f32 %v2115_v7, %v938_v29  ;;  %v870_v21 = vmul.f32 %v1165_v8, %v1841_v12  ;;  %v553_v62 = vpop.xlane.xlu1 %552  ;;  %v556_v47 = vpop.xlane.xlu0 %555 }
 0x15a   :  { %1071 = vst.msk [vmem:[%s2559_s3 + $0x88] sm:$0xff] %vm78_vm0, %v1007_v26  ;;  %v939_v13 = vmul.f32 %v2109_v58, %v869_v10  ;;  %1178 = vrsqrt.f32 %v747_v46  ;;  %v685_v22 = vmul.f32 0.03125, %v553_v62  ;;  %v686_v59 = vmul.f32 0.03125, %v556_v47 }
 0x15b   :  { %v1167_v39 = vpop.eup %1166  ;;  %1072 = vst.msk [vmem:[%s2559_s3 + $0x90] sm:$0xff] %vm78_vm0, %v1008_v15  ;;  %v940_v33 = vmul.f32 %v2109_v58, %v870_v21  ;;  %1180 = vrsqrt.f32 %v748_v5 }
 0x15c   :  { %v1169_v12 = vpop.eup %1168  ;;  %v1009_v3 = vadd.f32 %v2115_v7, %v939_v13  ;;  %v871_v23 = vmul.f32 %v1167_v39, %v1844_v37  ;;  %v749_v50 = vadd.f32 1e-05, %v685_v22  ;;  %v750_v54 = vadd.f32 1e-05, %v686_v59 }
 0x15d   :  { %v1010_v14 = vadd.f32 %v2115_v7, %v940_v33  ;;  %v872_v2 = vmul.f32 %v1169_v12, %v1853_v16  ;;  %v559_v42 = vpop.xlane.xlu1 %558  ;;  %v562_v25 = vpop.xlane.xlu0 %561 }
 0x15e   :  { %1073 = vst.msk [vmem:[%s2559_s3 + $0x98] sm:$0xff] %vm78_vm0, %v1009_v3  ;;  %v941_v31 = vmul.f32 %v2109_v58, %v871_v23  ;;  %1182 = vrsqrt.f32 %v749_v50  ;;  %v687_v6 = vmul.f32 0.03125, %v559_v42  ;;  %v688_v30 = vmul.f32 0.03125, %v562_v25 }
 0x15f   :  { %v1171_v9 = vpop.eup %1170  ;;  %1074 = vst.msk [vmem:[%s2559_s3 + $0xa0] sm:$0xff] %vm78_vm0, %v1010_v14  ;;  %v942_v37 = vmul.f32 %v2109_v58, %v872_v2  ;;  %1184 = vrsqrt.f32 %v750_v54 }
 0x160   :  { %v1173_v16 = vpop.eup %1172  ;;  %v1011_v17 = vadd.f32 %v2115_v7, %v941_v31  ;;  %v873_v55 = vmul.f32 %v1171_v9, %v1856_v41  ;;  %v751_v0 = vadd.f32 1e-05, %v687_v6  ;;  %v752_v18 = vadd.f32 1e-05, %v688_v30 }
 0x161   :  { %v1012_v34 = vadd.f32 %v2115_v7, %v942_v37  ;;  %v874_v38 = vmul.f32 %v1173_v16, %v1865_v20  ;;  %v565_v63 = vpop.xlane.xlu1 %564  ;;  %v568_v51 = vpop.xlane.xlu0 %567 }
 0x162   :  { %1075 = vst.msk [vmem:[%s2559_s3 + $0xa8] sm:$0xff] %vm78_vm0, %v1011_v17  ;;  %v943_v1 = vmul.f32 %v2109_v58, %v873_v55  ;;  %1186 = vrsqrt.f32 %v751_v0  ;;  %v689_v29 = vmul.f32 0.03125, %v565_v63  ;;  %v690_v8 = vmul.f32 0.03125, %v568_v51 }
 0x163   :  { %v1175_v26 = vpop.eup %1174  ;;  %1076 = vst.msk [vmem:[%s2559_s3 + $0xb0] sm:$0xff] %vm78_vm0, %v1012_v34  ;;  %v944_v41 = vmul.f32 %v2109_v58, %v874_v38  ;;  %1188 = vrsqrt.f32 %v752_v18 }
 0x164   :  { %v1177_v20 = vpop.eup %1176  ;;  %v1013_v10 = vadd.f32 %v2115_v7, %v943_v1  ;;  %v875_v46 = vmul.f32 %v1175_v26, %v1868_v45  ;;  %v753_v5 = vadd.f32 1e-05, %v689_v29  ;;  %v754_v15 = vadd.f32 1e-05, %v690_v8 }
 0x165   :  { %v1014_v21 = vadd.f32 %v2115_v7, %v944_v41  ;;  %v876_v62 = vmul.f32 %v1177_v20, %v1877_v24  ;;  %v571_v47 = vpop.xlane.xlu1 %570  ;;  %v574_v13 = vpop.xlane.xlu0 %573 }
 0x166   :  { %1077 = vst.msk [vmem:[%s2559_s3 + $0xb8] sm:$0xff] %vm78_vm0, %v1013_v10  ;;  %v945_v22 = vmul.f32 %v2109_v58, %v875_v46  ;;  %1190 = vrsqrt.f32 %v753_v5  ;;  %v691_v59 = vmul.f32 0.03125, %v571_v47  ;;  %v692_v39 = vmul.f32 0.03125, %v574_v13 }
 0x167   :  { %v1179_v33 = vpop.eup %1178  ;;  %1078 = vst.msk [vmem:[%s2559_s3 + $0xc0] sm:$0xff] %vm78_vm0, %v1014_v21  ;;  %v946_v45 = vmul.f32 %v2109_v58, %v876_v62  ;;  %1192 = vrsqrt.f32 %v754_v15 }
 0x168   :  { %v1181_v24 = vpop.eup %1180  ;;  %v1015_v12 = vadd.f32 %v2115_v7, %v945_v22  ;;  %v877_v3 = vmul.f32 %v1179_v33, %v1880_v49  ;;  %v755_v23 = vadd.f32 1e-05, %v691_v59  ;;  %v756_v50 = vadd.f32 1e-05, %v692_v39 }
 0x169   :  { %v1016_v54 = vadd.f32 %v2115_v7, %v946_v45  ;;  %v878_v14 = vmul.f32 %v1181_v24, %v1889_v28  ;;  %v577_v2 = vpop.xlane.xlu1 %576  ;;  %v580_v42 = vpop.xlane.xlu0 %579 }
 0x16a   :  { %1079 = vst.msk [vmem:[%s2559_s3 + $0xc8] sm:$0xff] %vm78_vm0, %v1015_v12  ;;  %v947_v25 = vmul.f32 %v2109_v58, %v877_v3  ;;  %1194 = vrsqrt.f32 %v755_v23  ;;  %v693_v31 = vmul.f32 0.03125, %v577_v2  ;;  %v694_v6 = vmul.f32 0.03125, %v580_v42 }
 0x16b   :  { %v1183_v30 = vpop.eup %1182  ;;  %1080 = vst.msk [vmem:[%s2559_s3 + $0xd0] sm:$0xff] %vm78_vm0, %v1016_v54  ;;  %v948_v49 = vmul.f32 %v2109_v58, %v878_v14  ;;  %1196 = vrsqrt.f32 %v756_v50 }
 0x16c   :  { %v1185_v28 = vpop.eup %1184  ;;  %v1017_v9 = vadd.f32 %v2115_v7, %v947_v25  ;;  %v879_v37 = vmul.f32 %v1183_v30, %v1892_v53  ;;  %v757_v16 = vadd.f32 1e-05, %v693_v31  ;;  %v758_v17 = vadd.f32 1e-05, %v694_v6 }
 0x16d   :  { %v1018_v55 = vadd.f32 %v2115_v7, %v948_v49  ;;  %v880_v0 = vmul.f32 %v1185_v28, %v1901_v32  ;;  %v583_v18 = vpop.xlane.xlu1 %582  ;;  %v586_v34 = vpop.xlane.xlu0 %585 }
 0x16e   :  { %1081 = vst.msk [vmem:[%s2559_s3 + $0xd8] sm:$0xff] %vm78_vm0, %v1017_v9  ;;  %v949_v38 = vmul.f32 %v2109_v58, %v879_v37  ;;  %1198 = vrsqrt.f32 %v757_v16  ;;  %v695_v63 = vmul.f32 0.03125, %v583_v18  ;;  %v696_v51 = vmul.f32 0.03125, %v586_v34 }
 0x16f   :  { %v1187_v1 = vpop.eup %1186  ;;  %1082 = vst.msk [vmem:[%s2559_s3 + $0xe0] sm:$0xff] %vm78_vm0, %v1018_v55  ;;  %v950_v53 = vmul.f32 %v2109_v58, %v880_v0  ;;  %1200 = vrsqrt.f32 %v758_v17 }
 0x170   :  { %v1189_v32 = vpop.eup %1188  ;;  %v1019_v29 = vadd.f32 %v2115_v7, %v949_v38  ;;  %v881_v8 = vmul.f32 %v1187_v1, %v1904_v57  ;;  %v759_v26 = vadd.f32 1e-05, %v695_v63  ;;  %v760_v41 = vadd.f32 1e-05, %v696_v51 }
 0x171   :  { %v1020_v20 = vadd.f32 %v2115_v7, %v950_v53  ;;  %v882_v10 = vmul.f32 %v1189_v32, %v1913_v36  ;;  %v589_v46 = vpop.xlane.xlu1 %588  ;;  %v592_v5 = vpop.xlane.xlu0 %591 }
 0x172   :  { %1083 = vst.msk [vmem:[%s2559_s3 + $0xe8] sm:$0xff] %vm78_vm0, %v1019_v29  ;;  %v951_v15 = vmul.f32 %v2109_v58, %v881_v8  ;;  %1202 = vrsqrt.f32 %v759_v26  ;;  %v697_v21 = vmul.f32 0.03125, %v589_v46  ;;  %v698_v62 = vmul.f32 0.03125, %v592_v5 }
 0x173   :  { %v1191_v47 = vpop.eup %1190  ;;  %1084 = vst.msk [vmem:[%s2559_s3 + $0xf0] sm:$0xff] %vm78_vm0, %v1020_v20  ;;  %v952_v57 = vmul.f32 %v2109_v58, %v882_v10  ;;  %1204 = vrsqrt.f32 %v760_v41 }
 0x174   :  { %v1193_v36 = vpop.eup %1192  ;;  %v1021_v13 = vadd.f32 %v2115_v7, %v951_v15  ;;  %v883_v22 = vmul.f32 %v1191_v47, %v1916_v61  ;;  %v761_v59 = vadd.f32 1e-05, %v697_v21  ;;  %v762_v39 = vadd.f32 1e-05, %v698_v62 }
 0x175   :  { %v1022_v33 = vadd.f32 %v2115_v7, %v952_v57  ;;  %v884_v45 = vmul.f32 %v1193_v36, %v1925_v40  ;;  %v595_v24 = vpop.xlane.xlu1 %594  ;;  %v598_v12 = vpop.xlane.xlu0 %597 }
 0x176   :  { %1085 = vst.msk [vmem:[%s2559_s3 + $0xf8] sm:$0xff] %vm78_vm0, %v1021_v13  ;;  %v953_v3 = vmul.f32 %v2109_v58, %v883_v22  ;;  %1206 = vrsqrt.f32 %v761_v59  ;;  %v699_v23 = vmul.f32 0.03125, %v595_v24  ;;  %v700_v50 = vmul.f32 0.03125, %v598_v12 }
 0x177   :  { %v1195_v54 = vpop.eup %1194  ;;  %1086 = vst.msk [vmem:[%s2559_s3 + $0x100] sm:$0xff] %vm78_vm0, %v1022_v33  ;;  %v954_v61 = vmul.f32 %v2109_v58, %v884_v45  ;;  %1208 = vrsqrt.f32 %v762_v39 }
 0x178   :  { %v1197_v40 = vpop.eup %1196  ;;  %v1023_v14 = vadd.f32 %v2115_v7, %v953_v3  ;;  %v885_v2 = vmul.f32 %v1195_v54, %v1928_v4  ;;  %v763_v42 = vadd.f32 1e-05, %v699_v23  ;;  %v764_v25 = vadd.f32 1e-05, %v700_v50 }
 0x179   :  { %v1024_v31 = vadd.f32 %v2115_v7, %v954_v61  ;;  %v886_v6 = vmul.f32 %v1197_v40, %v1937_v44  ;;  %v601_v30 = vpop.xlane.xlu1 %600  ;;  %v604_v49 = vpop.xlane.xlu0 %603 }
 0x17a   :  { %1087 = vst.msk [vmem:[%s2559_s3 + $0x108] sm:$0xff] %vm78_vm0, %v1023_v14  ;;  %v955_v28 = vmul.f32 %v2109_v58, %v885_v2  ;;  %1210 = vrsqrt.f32 %v763_v42  ;;  %v701_v9 = vmul.f32 0.03125, %v601_v30  ;;  %v702_v37 = vmul.f32 0.03125, %v604_v49 }
 0x17b   :  { %v1199_v16 = vpop.eup %1198  ;;  %1088 = vst.msk [vmem:[%s2559_s3 + $0x110] sm:$0xff] %vm78_vm0, %v1024_v31  ;;  %v956_v4 = vmul.f32 %v2109_v58, %v886_v6  ;;  %1212 = vrsqrt.f32 %v764_v25 }
 0x17c   :  { %v1201_v44 = vpop.eup %1200  ;;  %v1025_v17 = vadd.f32 %v2115_v7, %v955_v28  ;;  %v887_v55 = vmul.f32 %v1199_v16, %v1940_v11  ;;  %v765_v0 = vadd.f32 1e-05, %v701_v9  ;;  %v766_v18 = vadd.f32 1e-05, %v702_v37 }
 0x17d   :  { %v1026_v34 = vadd.f32 %v2115_v7, %v956_v4  ;;  %v888_v38 = vmul.f32 %v1201_v44, %v1949_v48  ;;  %v607_v63 = vpop.xlane.xlu1 %606  ;;  %v610_v51 = vpop.xlane.xlu0 %609 }
 0x17e   :  { %1089 = vst.msk [vmem:[%s2559_s3 + $0x118] sm:$0xff] %vm78_vm0, %v1025_v17  ;;  %v957_v1 = vmul.f32 %v2109_v58, %v887_v55  ;;  %1214 = vrsqrt.f32 %v765_v0  ;;  %v703_v53 = vmul.f32 0.03125, %v607_v63  ;;  %v704_v32 = vmul.f32 0.03125, %v610_v51  ;;  %v2638_v17 = vld [vmem:[#allocation16_spill] sm:$0xff] }
 0x17f   :  { %v1203_v29 = vpop.eup %1202  ;;  %1090 = vst.msk [vmem:[%s2559_s3 + $0x120] sm:$0xff] %vm78_vm0, %v1026_v34  ;;  %v958_v11 = vmul.f32 %v2109_v58, %v888_v38  ;;  %1216 = vrsqrt.f32 %v766_v18 }
 0x180   :  { %v1205_v48 = vpop.eup %1204  ;;  %v1027_v8 = vadd.f32 %v2115_v7, %v957_v1  ;;  %v889_v26 = vmul.f32 %v1203_v29, %v1952_v19  ;;  %v767_v41 = vadd.f32 1e-05, %v703_v53  ;;  %v768_v20 = vadd.f32 1e-05, %v704_v32  ;;  %v2639_v32 = vld [vmem:[#allocation17_spill] sm:$0xff] }
 0x181   :  { %v1028_v10 = vadd.f32 %v2115_v7, %v958_v11  ;;  %v890_v46 = vmul.f32 %v1205_v48, %v1961_v52  ;;  %v613_v5 = vpop.xlane.xlu1 %612  ;;  %v616_v15 = vpop.xlane.xlu0 %615 }
 0x182   :  { %1091 = vst.msk [vmem:[%s2559_s3 + $0x128] sm:$0xff] %vm78_vm0, %v1027_v8  ;;  %v959_v21 = vmul.f32 %v2109_v58, %v889_v26  ;;  %1218 = vrsqrt.f32 %v767_v41  ;;  %v705_v62 = vmul.f32 0.03125, %v613_v5  ;;  %v706_v47 = vmul.f32 0.03125, %v616_v15  ;;  %v2640_v26 = vld [vmem:[#allocation18_spill] sm:$0xff] }
 0x183   :  { %v1207_v57 = vpop.eup %1206  ;;  %1092 = vst.msk [vmem:[%s2559_s3 + $0x130] sm:$0xff] %vm78_vm0, %v1028_v10  ;;  %v960_v19 = vmul.f32 %v2109_v58, %v890_v46  ;;  %1220 = vrsqrt.f32 %v768_v20 }
 0x184   :  { %v1209_v52 = vpop.eup %1208  ;;  %v1029_v36 = vadd.f32 %v2115_v7, %v959_v21  ;;  %v891_v13 = vmul.f32 %v1207_v57, %v1964_v27  ;;  %v769_v22 = vadd.f32 1e-05, %v705_v62  ;;  %v770_v59 = vadd.f32 1e-05, %v706_v47 }
 0x185   :  { %v1030_v39 = vadd.f32 %v2115_v7, %v960_v19  ;;  %v892_v33 = vmul.f32 %v1209_v52, %v1973_v56  ;;  %v619_v45 = vpop.xlane.xlu1 %618  ;;  %v622_v24 = vpop.xlane.xlu0 %621  ;;  %v2641_v19 = vld [vmem:[#allocation19_spill] sm:$0xff] }
 0x186   :  { %1093 = vst.msk [vmem:[%s2559_s3 + $0x138] sm:$0xff] %vm78_vm0, %v1029_v36  ;;  %v961_v12 = vmul.f32 %v2109_v58, %v891_v13  ;;  %1222 = vrsqrt.f32 %v769_v22  ;;  %v707_v3 = vmul.f32 0.03125, %v619_v45  ;;  %v708_v23 = vmul.f32 0.03125, %v622_v24 }
 0x187   :  { %v1211_v50 = vpop.eup %1210  ;;  %1094 = vst.msk [vmem:[%s2559_s3 + $0x140] sm:$0xff] %vm78_vm0, %v1030_v39  ;;  %v962_v27 = vmul.f32 %v2109_v58, %v892_v33  ;;  %1224 = vrsqrt.f32 %v770_v59  ;;  %v2642_v59 = vld [vmem:[#allocation2_spill] sm:$0xff] }
 0x188   :  { %v1213_v56 = vpop.eup %1212  ;;  %v1031_v54 = vadd.f32 %v2115_v7, %v961_v12  ;;  %v893_v61 = vmul.f32 %v1211_v50, %v1976_v35  ;;  %v771_v40 = vadd.f32 1e-05, %v707_v3  ;;  %v772_v14 = vadd.f32 1e-05, %v708_v23 }
 0x189   :  { %v1032_v2 = vadd.f32 %v2115_v7, %v962_v27  ;;  %v894_v42 = vmul.f32 %v1213_v56, %v1985_v60  ;;  %v625_v25 = vpop.xlane.xlu1 %624  ;;  %v628_v31 = vpop.xlane.xlu0 %627 }
 0x18a   :  { %1095 = vst.msk [vmem:[%s2559_s3 + $0x148] sm:$0xff] %vm78_vm0, %v1031_v54  ;;  %v963_v6 = vmul.f32 %v2109_v58, %v893_v61  ;;  %1226 = vrsqrt.f32 %v771_v40  ;;  %v709_v30 = vmul.f32 0.03125, %v625_v25  ;;  %v710_v49 = vmul.f32 0.03125, %v628_v31  ;;  %v2643_v54 = vld [vmem:[#allocation3_spill] sm:$0xff] }
 0x18b   :  { %v1215_v28 = vpop.eup %1214  ;;  %1096 = vst.msk [vmem:[%s2559_s3 + $0x150] sm:$0xff] %vm78_vm0, %v1032_v2  ;;  %v964_v35 = vmul.f32 %v2109_v58, %v894_v42  ;;  %1228 = vrsqrt.f32 %v772_v14  ;;  %v2644_v42 = vld [vmem:[#allocation4_spill] sm:$0xff] }
 0x18c   :  { %v1217_v60 = vpop.eup %1216  ;;  %v1033_v9 = vadd.f32 %v2115_v7, %v963_v6  ;;  %v895_v37 = vmul.f32 %v1215_v28, %v1988_v43  ;;  %v773_v16 = vadd.f32 1e-05, %v709_v30  ;;  %v774_v4 = vadd.f32 1e-05, %v710_v49 }
 0x18d   :  { %v1034_v44 = vadd.f32 %v2115_v7, %v964_v35  ;;  %v896_v55 = vmul.f32 %v1217_v60, %v2638_v17  ;;  %v631_v0 = vpop.xlane.xlu1 %630  ;;  %v634_v18 = vpop.xlane.xlu0 %633 }
 0x18e   :  { %1097 = vst.msk [vmem:[%s2559_s3 + $0x158] sm:$0xff] %vm78_vm0, %v1033_v9  ;;  %v965_v34 = vmul.f32 %v2109_v58, %v895_v37  ;;  %1230 = vrsqrt.f32 %v773_v16  ;;  %v711_v38 = vmul.f32 0.03125, %v631_v0  ;;  %v712_v63 = vmul.f32 0.03125, %v634_v18  ;;  %v2645_v16 = vld [vmem:[#allocation5_spill] sm:$0xff]  ;;  %v2646_v0 = vld [vmem:[#allocation6_spill] sm:$0xff] }
 0x18f   :  { %v1219_v51 = vpop.eup %1218  ;;  %1098 = vst.msk [vmem:[%s2559_s3 + $0x160] sm:$0xff] %vm78_vm0, %v1034_v44  ;;  %v966_v43 = vmul.f32 %v2109_v58, %v896_v55  ;;  %1232 = vrsqrt.f32 %v774_v4 }
 0x190   :  { %v1221_v1 = vpop.eup %1220  ;;  %v1035_v53 = vadd.f32 %v2115_v7, %v965_v34  ;;  %v897_v29 = vmul.f32 %v1219_v51, %v2639_v32  ;;  %v775_v11 = vadd.f32 1e-05, %v711_v38  ;;  %v776_v48 = vadd.f32 1e-05, %v712_v63  ;;  %v2647_v32 = vld [vmem:[#allocation7_spill] sm:$0xff] }
 0x191   :  { %v1036_v8 = vadd.f32 %v2115_v7, %v966_v43  ;;  %v898_v41 = vmul.f32 %v1221_v1, %v2640_v26  ;;  %v637_v20 = vpop.xlane.xlu1 %636  ;;  %v640_v10 = vpop.xlane.xlu0 %639 }
 0x192   :  { %1099 = vst.msk [vmem:[%s2559_s3 + $0x168] sm:$0xff] %vm78_vm0, %v1035_v53  ;;  %v967_v46 = vmul.f32 %v2109_v58, %v897_v29  ;;  %1234 = vrsqrt.f32 %v775_v11  ;;  %v713_v5 = vmul.f32 0.03125, %v637_v20  ;;  %v714_v15 = vmul.f32 0.03125, %v640_v10 }
 0x193   :  { %v1223_v21 = vpop.eup %1222  ;;  %1100 = vst.msk [vmem:[%s2559_s3 + $0x170] sm:$0xff] %vm78_vm0, %v1036_v8  ;;  %v968_v62 = vmul.f32 %v2109_v58, %v898_v41  ;;  %1236 = vrsqrt.f32 %v776_v48  ;;  %v2648_v8 = vld [vmem:[#allocation8_spill] sm:$0xff] }
 0x194   :  { %v1225_v47 = vpop.eup %1224  ;;  %v1037_v57 = vadd.f32 %v2115_v7, %v967_v46  ;;  %v899_v52 = vmul.f32 %v1223_v21, %v2641_v19  ;;  %v777_v36 = vadd.f32 1e-05, %v713_v5  ;;  %v778_v13 = vadd.f32 1e-05, %v714_v15  ;;  %v2649_v15 = vld [vmem:[#allocation9_spill] sm:$0xff] }
 0x195   :  { %v1038_v22 = vadd.f32 %v2115_v7, %v968_v62  ;;  %v900_v39 = vmul.f32 %v1225_v47, %v2642_v59  ;;  %v643_v33 = vpop.xlane.xlu1 %642  ;;  %v646_v45 = vpop.xlane.xlu0 %645  ;;  %v2650_v47 = vld [vmem:[#allocation10_spill] sm:$0xff]  ;;  %v2651_v59 = vld [vmem:[#allocation11_spill] sm:$0xff] }
 0x196   :  { %1101 = vst.msk [vmem:[%s2559_s3 + $0x178] sm:$0xff] %vm78_vm0, %v1037_v57  ;;  %v969_v24 = vmul.f32 %v2109_v58, %v899_v52  ;;  %1238 = vrsqrt.f32 %v777_v36  ;;  %v715_v12 = vmul.f32 0.03125, %v643_v33  ;;  %v716_v3 = vmul.f32 0.03125, %v646_v45  ;;  %v1252_v19 = vld [vmem:[%s2557_s1] ss:$0 sm:$0xff]  ;;  %v2652_v45 = vld [vmem:[#allocation12_spill] sm:$0xff] }
 0x197   :  { %v1227_v23 = vpop.eup %1226  ;;  %1102 = vst.msk [vmem:[%s2559_s3 + $0x180] sm:$0xff] %vm78_vm0, %v1038_v22  ;;  %v970_v50 = vmul.f32 %v2109_v58, %v900_v39  ;;  %1240 = vrsqrt.f32 %v778_v13  ;;  %v1253_v13 = vld [vmem:[%s2558_s2] ss:$0 sm:$0xff] }
 0x198   :  { %v1229_v27 = vpop.eup %1228  ;;  %v1039_v56 = vadd.f32 %v2115_v7, %v969_v24  ;;  %v901_v61 = vmul.f32 %v1227_v23, %v2643_v54  ;;  %v779_v40 = vadd.f32 1e-05, %v715_v12  ;;  %v780_v14 = vadd.f32 1e-05, %v716_v3 }
 0x199   :  { %v1040_v2 = vadd.f32 %v2115_v7, %v970_v50  ;;  %v902_v25 = vmul.f32 %v1229_v27, %v2644_v42  ;;  %v649_v31 = vpop.xlane.xlu1 %648  ;;  %v652_v6 = vpop.xlane.xlu0 %651 }
 0x19a   :  { %1103 = vst.msk [vmem:[%s2559_s3 + $0x188] sm:$0xff] %vm78_vm0, %v1039_v56  ;;  %v971_v30 = vmul.f32 %v2109_v58, %v901_v61  ;;  %1242 = vrsqrt.f32 %v779_v40  ;;  %v717_v49 = vmul.f32 0.03125, %v649_v31  ;;  %v718_v28 = vmul.f32 0.03125, %v652_v6  ;;  %v2653_v56 = vld [vmem:[#allocation13_spill] sm:$0xff]  ;;  %v2654_v40 = vld [vmem:[#allocation14_spill] sm:$0xff]  ;;  %v2655_v6 = vld [vmem:[#allocation20_spill] sm:$0xff] }
 0x19b   :  { %v1231_v35 = vpop.eup %1230  ;;  %1104 = vst.msk [vmem:[%s2559_s3 + $0x190] sm:$0xff] %vm78_vm0, %v1040_v2  ;;  %v972_v60 = vmul.f32 %v2109_v58, %v902_v25  ;;  %1244 = vrsqrt.f32 %v780_v14 }
 0x19c   :  { %v1233_v9 = vpop.eup %1232  ;;  %v1041_v37 = vadd.f32 %v2115_v7, %v971_v30  ;;  %v903_v4 = vmul.f32 %v1231_v35, %v2645_v16  ;;  %v781_v44 = vadd.f32 1e-05, %v717_v49  ;;  %v782_v17 = vadd.f32 1e-05, %v718_v28 }
 0x19d   :  { %v1042_v55 = vadd.f32 %v2115_v7, %v972_v60  ;;  %v904_v18 = vmul.f32 %v1233_v9, %v2646_v0  ;;  %v655_v34 = vpop.xlane.xlu1 %654 }
 0x19e   :  { %1105 = vst.msk [vmem:[%s2559_s3 + $0x198] sm:$0xff] %vm78_vm0, %v1041_v37  ;;  %v973_v38 = vmul.f32 %v2109_v58, %v903_v4  ;;  %1246 = vrsqrt.f32 %v781_v44  ;;  %v719_v63 = vmul.f32 0.03125, %v655_v34 }
 0x19f   :  { %v1235_v51 = vpop.eup %1234  ;;  %1106 = vst.msk [vmem:[%s2559_s3 + $0x1a0] sm:$0xff] %vm78_vm0, %v1042_v55  ;;  %v974_v43 = vmul.f32 %v2109_v58, %v904_v18  ;;  %1248 = vrsqrt.f32 %v782_v17 }
 0x1a0   :  { %v1237_v1 = vpop.eup %1236  ;;  %v1043_v53 = vadd.f32 %v2115_v7, %v973_v38  ;;  %v905_v29 = vmul.f32 %v1235_v51, %v2647_v32  ;;  %v783_v11 = vadd.f32 1e-05, %v719_v63 }
 0x1a1   :  { %v1044_v48 = vadd.f32 %v2115_v7, %v974_v43  ;;  %v906_v26 = vmul.f32 %v1237_v1, %v2648_v8 }
 0x1a2   :  { %1107 = vst.msk [vmem:[%s2559_s3 + $0x1a8] sm:$0xff] %vm78_vm0, %v1043_v53  ;;  %v975_v41 = vmul.f32 %v2109_v58, %v905_v29  ;;  %1250 = vrsqrt.f32 %v783_v11 }
 0x1a3   :  { %v1239_v20 = vpop.eup %1238  ;;  %1108 = vst.msk [vmem:[%s2559_s3 + $0x1b0] sm:$0xff] %vm78_vm0, %v1044_v48  ;;  %v976_v10 = vmul.f32 %v2109_v58, %v906_v26 }
 0x1a4   :  { %v1241_v46 = vpop.eup %1240  ;;  %v1045_v5 = vadd.f32 %v2115_v7, %v975_v41  ;;  %v907_v21 = vmul.f32 %v1239_v20, %v2649_v15 }
 0x1a5   :  { %v1046_v62 = vadd.f32 %v2115_v7, %v976_v10  ;;  %v908_v57 = vmul.f32 %v1241_v46, %v2650_v47 }
 0x1a6   :  { %1109 = vst.msk [vmem:[%s2559_s3 + $0x1b8] sm:$0xff] %vm78_vm0, %v1045_v5  ;;  %v977_v52 = vmul.f32 %v1252_v19, %v907_v21 }
 0x1a7   :  { %v1243_v58 = vpop.eup %1242  ;;  %1110 = vst.msk [vmem:[%s2559_s3 + $0x1c0] sm:$0xff] %vm78_vm0, %v1046_v62  ;;  %v978_v36 = vmul.f32 %v1252_v19, %v908_v57 }
 0x1a8   :  { %v1245_v7 = vpop.eup %1244  ;;  %v1047_v22 = vadd.f32 %v1253_v13, %v977_v52  ;;  %v909_v39 = vmul.f32 %v1243_v58, %v2651_v59 }
 0x1a9   :  { %v1048_v33 = vadd.f32 %v1253_v13, %v978_v36  ;;  %v910_v24 = vmul.f32 %v1245_v7, %v2652_v45 }
 0x1aa   :  { %1111 = vst.msk [vmem:[%s2559_s3 + $0x1c8] sm:$0xff] %vm78_vm0, %v1047_v22  ;;  %v979_v12 = vmul.f32 %v1252_v19, %v909_v39 }
 0x1ab   :  { %v1247_v3 = vpop.eup %1246  ;;  %1112 = vst.msk [vmem:[%s2559_s3 + $0x1d0] sm:$0xff] %vm78_vm0, %v1048_v33  ;;  %v980_v23 = vmul.f32 %v1252_v19, %v910_v24 }
 0x1ac   :  { %v1249_v50 = vpop.eup %1248  ;;  %v1049_v27 = vadd.f32 %v1253_v13, %v979_v12  ;;  %v911_v54 = vmul.f32 %v1247_v3, %v2653_v56 }
 0x1ad   :  { %v1050_v61 = vadd.f32 %v1253_v13, %v980_v23  ;;  %v912_v14 = vmul.f32 %v1249_v50, %v2654_v40 }
 0x1ae   :  { %1113 = vst.msk [vmem:[%s2559_s3 + $0x1d8] sm:$0xff] %vm78_vm0, %v1049_v27  ;;  %v981_v2 = vmul.f32 %v1252_v19, %v911_v54 }
 0x1af   :  { %v1251_v42 = vpop.eup %1250  ;;  %1114 = vst.msk [vmem:[%s2559_s3 + $0x1e0] sm:$0xff] %vm78_vm0, %v1050_v61  ;;  %v982_v25 = vmul.f32 %v1252_v19, %v912_v14 }
 0x1b0   :  { %v1051_v31 = vadd.f32 %v1253_v13, %v981_v2  ;;  %v913_v30 = vmul.f32 %v1251_v42, %v2655_v6 }
 0x1b1   :  { %v1052_v49 = vadd.f32 %v1253_v13, %v982_v25 }
 0x1b2   :  { %1115 = vst.msk [vmem:[%s2559_s3 + $0x1e8] sm:$0xff] %vm78_vm0, %v1051_v31  ;;  %v983_v28 = vmul.f32 %v1252_v19, %v913_v30 }
 0x1b3   :  { %1116 = vst.msk [vmem:[%s2559_s3 + $0x1f0] sm:$0xff] %vm78_vm0, %v1052_v49 }
 0x1b4   :  { %v1053_v35 = vadd.f32 %v1253_v13, %v983_v28 }
 0x1b6   :  { %1117 = vst.msk [vmem:[%s2559_s3 + $0x1f8] sm:$0xff] %vm78_vm0, %v1053_v35 }

</bundles_post_ra>
